<compile_context>
chip_gen: v6e
topology: v6e:2x2x1
jax: 0.10.0
libtpu: 0.0.40
codegen_flags: <defaults>
</compile_context>

<pallas_src>
import functools

import jax
import jax.numpy as jnp
import numpy as np
from jax import lax
from jax.experimental import pallas as pl
from jax.experimental.pallas import tpu as pltpu

KSIZE = 7
PAD = 3


def _lesion_attention_kernel(x_ref, w1_ref, b1_ref, w2_ref, b2_ref,
                             ws_ref, cmask_ref, bs_ref, o_ref,
                             avg_ref, max_ref, att_ref, sp_ref,
                             *, h, w, chunk):
    C, HW = x_ref.shape
    nchunks = C // chunk

    # ---------- Phase 1: global avg / max pool per channel (chunked) ----------
    def pool_body(i, carry):
        c0 = pl.multiple_of(i * chunk, chunk)
        xc = x_ref[pl.ds(c0, chunk), :]                            # (chunk, HW)
        avg_ref[pl.ds(c0, chunk), :] = jnp.mean(xc, axis=1, keepdims=True)
        max_ref[pl.ds(c0, chunk), :] = jnp.max(xc, axis=1, keepdims=True)
        return carry

    lax.fori_loop(0, nchunks, pool_body, None)

    # ---------- Phase 2: channel MLP (tiny matmuls, shared weights) ----------
    def mlp(v):                                                    # (C,1)->(C,1)
        hmid = jnp.dot(w1_ref[...], v, preferred_element_type=jnp.float32)
        hmid = jnp.maximum(hmid + b1_ref[...], 0.0)
        return jnp.dot(w2_ref[...], hmid,
                       preferred_element_type=jnp.float32) + b2_ref[...]

    att_ref[...] = jax.nn.sigmoid(mlp(avg_ref[...]) + mlp(max_ref[...]))

    # ---------- Phase 3: channel mean / max of (x * att), streamed ----------
    def red_body(i, carry):
        s, m = carry
        c0 = pl.multiple_of(i * chunk, chunk)
        xa = x_ref[pl.ds(c0, chunk), :] * att_ref[pl.ds(c0, chunk), :]
        s = s + jnp.sum(xa, axis=0, keepdims=True)
        m = jnp.maximum(m, jnp.max(xa, axis=0, keepdims=True))
        return s, m

    s0 = jnp.zeros((1, HW), jnp.float32)
    m0 = jnp.full((1, HW), -jnp.inf, dtype=jnp.float32)
    ssum, smax = lax.fori_loop(0, nchunks, red_body, (s0, m0))

    # planes: row 0 = mean plane, row 1 = max plane   (no concat needed)
    row_id = lax.broadcasted_iota(jnp.int32, (2, HW), 0)
    planes = jnp.where(row_id == 0, ssum * (1.0 / C), smax)        # (2, HW)

    # ---------- Phase 4: 7x7 conv on the flattened (lane-dense) planes -------
    idx = lax.broadcasted_iota(jnp.int32, (2, HW), 1)              # flat index
    acc = jnp.zeros((2, HW), jnp.float32)
    for ki in range(KSIZE):
        di = ki - PAD
        shift_r = (-di * w) % HW
        p_r = pltpu.roll(planes, shift_r, axis=1) if shift_r else planes
        # Row-boundary mask is a contiguous flat range: one compare + select.
        if di < 0:
            p_r = jnp.where(idx >= (-di) * w, p_r, 0.0)
        elif di > 0:
            p_r = jnp.where(idx < (h - di) * w, p_r, 0.0)
        for kj in range(KSIZE):
            dj = kj - PAD
            shift_c = (-dj) % HW
            shifted = pltpu.roll(p_r, shift_c, axis=1) if shift_c else p_r
            term = shifted if dj == 0 else shifted * cmask_ref[kj:kj + 1, :]
            tap = ki * KSIZE + kj
            acc = acc + term * ws_ref[:, tap:tap + 1]              # (2,1) weight

    conv = jnp.sum(acc, axis=0, keepdims=True) + bs_ref[0]         # (1, HW)
    sp_ref[...] = jax.nn.sigmoid(conv)

    # ---------- Phase 5: fused output  o = x * channel_att * spatial_att -----
    def out_body(i, carry):
        c0 = pl.multiple_of(i * chunk, chunk)
        o_ref[pl.ds(c0, chunk), :] = (
            x_ref[pl.ds(c0, chunk), :]
            * att_ref[pl.ds(c0, chunk), :]
            * sp_ref[...]).astype(o_ref.dtype)
        return carry

    lax.fori_loop(0, nchunks, out_body, None)


@jax.jit
def lesion_attention(x, w1, b1, w2, b2, ws, bs):
    """x: (B, C, H, W) f32. Returns (B, C, H, W) f32."""
    B, C, H, W = x.shape
    C8 = w1.shape[0]
    HW = H * W
    chunk = max(c for c in (8, 4, 2, 1) if C % c == 0)

    x_flat = x.reshape(B, C, HW)                 # lane-dense spatial layout
    ws2 = ws.reshape(2, KSIZE * KSIZE)           # (2, 49) spatial conv weights
    bs_vec = bs.reshape(1)                       # (1,) spatial conv bias (SMEM)

    # Static {0,1} column-boundary masks for the flattened 7x7 conv.
    col = np.arange(HW, dtype=np.int64) % W
    cmask_np = np.stack(
        [((col + (kj - PAD) >= 0) & (col + (kj - PAD) < W)) for kj in range(KSIZE)],
        axis=0).astype(np.float32)               # (7, HW)
    cmask = jnp.asarray(cmask_np)

    kernel = functools.partial(_lesion_attention_kernel, h=H, w=W, chunk=chunk)

    slab = C * HW * 4
    need = (4 * slab                                              # x/out dbl-buf
            + 2 * 4 * (C8 * C + C8 + C * C8 + C
                       + 2 * KSIZE * KSIZE + KSIZE * HW)          # params dbl-buf
            + 4 * (3 * C + HW)                                    # scratch
            + (2 << 20))                                          # slack
    vmem_limit = int(min(max(need, 16 * 2**20), 100 * 2**20))

    out_flat = pl.pallas_call(
        kernel,
        out_shape=jax.ShapeDtypeStruct((B, C, HW), jnp.float32),
        grid=(B,),
        in_specs=[
            pl.BlockSpec((None, C, HW), lambda b: (b, 0, 0)),       # x
            pl.BlockSpec((C8, C), lambda b: (0, 0)),                # fc1 w
            pl.BlockSpec((C8, 1), lambda b: (0, 0)),                # fc1 b
            pl.BlockSpec((C, C8), lambda b: (0, 0)),                # fc2 w
            pl.BlockSpec((C, 1), lambda b: (0, 0)),                 # fc2 b
            pl.BlockSpec((2, KSIZE * KSIZE), lambda b: (0, 0)),     # conv w
            pl.BlockSpec((KSIZE, HW), lambda b: (0, 0)),            # col masks
            pl.BlockSpec(memory_space=pltpu.MemorySpace.SMEM),      # conv bias
        ],
        out_specs=pl.BlockSpec((None, C, HW), lambda b: (b, 0, 0)),
        scratch_shapes=[
            pltpu.VMEM((C, 1), jnp.float32),    # avg pool
            pltpu.VMEM((C, 1), jnp.float32),    # max pool
            pltpu.VMEM((C, 1), jnp.float32),    # channel attention
            pltpu.VMEM((1, HW), jnp.float32),   # spatial attention
        ],
        compiler_params=pltpu.CompilerParams(
            dimension_semantics=("parallel",),
            vmem_limit_bytes=vmem_limit),
    )(x_flat, w1, b1.reshape(C8, 1), w2, b2.reshape(C, 1), ws2, cmask, bs_vec)

    return out_flat.reshape(B, C, H, W)


def lesion_attention_reference(x, w1, b1, w2, b2, ws, bs):
    """Pure-JAX reference matching the PyTorch forward."""
    avg = jnp.mean(x, axis=(2, 3), keepdims=True)          # (B, C, 1, 1)
    mx = jnp.max(x, axis=(2, 3), keepdims=True)

    def mlp(v):
        h = jnp.einsum('oc,bcij->boij', w1, v) + b1.reshape(1, -1, 1, 1)
        h = jnp.maximum(h, 0.0)
        return jnp.einsum('oc,bcij->boij', w2, h) + b2.reshape(1, -1, 1, 1)

    channel_att = jax.nn.sigmoid(mlp(avg) + mlp(mx))
    x_ch = x * channel_att
    mean_sp = jnp.mean(x_ch, axis=1, keepdims=True)
    max_sp = jnp.max(x_ch, axis=1, keepdims=True)
    sp_in = jnp.concatenate([mean_sp, max_sp], axis=1)      # (B, 2, H, W)
    conv = jax.lax.conv_general_dilated(
        sp_in, ws.reshape(1, 2, KSIZE, KSIZE), (1, 1),
        padding=((PAD, PAD), (PAD, PAD)),
        dimension_numbers=('NCHW', 'OIHW', 'NCHW')) + bs
    return x_ch * jax.nn.sigmoid(conv)


if __name__ == "__main__":
    B, C, H, W = 2, 16, 16, 16           # in_channels=16 -> hidden = 16 // 8 = 2
    C8 = C // 8

    key = jax.random.PRNGKey(0)
    kx, k1, k2, k3, k4, k5, k6 = jax.random.split(key, 7)

    x = jax.random.normal(kx, (B, C, H, W), jnp.float32)
    # Deterministic synthetic parameters (shapes from the module's __init__).
    w1 = 0.20 * jax.random.normal(k1, (C8, C), jnp.float32)            # fc1 1x1
    b1 = 0.05 * jax.random.normal(k2, (C8,), jnp.float32)
    w2 = 0.20 * jax.random.normal(k3, (C, C8), jnp.float32)            # fc2 1x1
    b2 = 0.05 * jax.random.normal(k4, (C,), jnp.float32)
    ws = 0.10 * jax.random.normal(k5, (2, KSIZE, KSIZE), jnp.float32)  # 7x7 conv
    bs = 0.05 * jax.random.normal(k6, (1,), jnp.float32)

    out = lesion_attention(x, w1, b1, w2, b2, ws, bs)
    out = jax.block_until_ready(out)

    ref = lesion_attention_reference(x, w1, b1, w2, b2, ws, bs)
    np.testing.assert_allclose(np.asarray(out), np.asarray(ref),
                               rtol=1e-4, atol=1e-4)
    print("KERNEL_OK")
</pallas_src>

<mosaic_0001>
module attributes {stable_mosaic.version = 11 : i64} {
  func.func @_lesion_attention_kernel(%arg0: i32, %arg1: memref<1x16x256xf32, #tpu.memory_space<vmem>>, %arg2: memref<2x16xf32, #tpu.memory_space<vmem>>, %arg3: memref<2x1xf32, #tpu.memory_space<vmem>>, %arg4: memref<16x2xf32, #tpu.memory_space<vmem>>, %arg5: memref<16x1xf32, #tpu.memory_space<vmem>>, %arg6: memref<2x49xf32, #tpu.memory_space<vmem>>, %arg7: memref<7x256xf32, #tpu.memory_space<vmem>>, %arg8: memref<1xf32, #tpu.memory_space<smem>>, %arg9: memref<1x16x256xf32, #tpu.memory_space<vmem>>, %arg10: memref<16x1xf32, #tpu.memory_space<vmem>>, %arg11: memref<16x1xf32, #tpu.memory_space<vmem>>, %arg12: memref<16x1xf32, #tpu.memory_space<vmem>>, %arg13: memref<1x256xf32, #tpu.memory_space<vmem>>) attributes {dimension_semantics = [#tpu.dimension_semantics<parallel>], iteration_bounds = array<i64: 2>, scalar_prefetch = 0 : i64, scratch_operands = 4 : i64, tpu.core_type = #tpu.core_type<tc>, window_params = [{transform_indices = @transform_0, window_bounds = array<i64: 1, 16, 256>}, {pipeline_mode = #tpu.pipeline_mode<synchronous>, transform_indices = @transform_1, window_bounds = array<i64: 2, 16>}, {pipeline_mode = #tpu.pipeline_mode<synchronous>, transform_indices = @transform_2, window_bounds = array<i64: 2, 1>}, {pipeline_mode = #tpu.pipeline_mode<synchronous>, transform_indices = @transform_3, window_bounds = array<i64: 16, 2>}, {pipeline_mode = #tpu.pipeline_mode<synchronous>, transform_indices = @transform_4, window_bounds = array<i64: 16, 1>}, {pipeline_mode = #tpu.pipeline_mode<synchronous>, transform_indices = @transform_5, window_bounds = array<i64: 2, 49>}, {pipeline_mode = #tpu.pipeline_mode<synchronous>, transform_indices = @transform_6, window_bounds = array<i64: 7, 256>}, {transform_indices = @transform_7, window_bounds = array<i64: 1>}, {transform_indices = @transform_8, window_bounds = array<i64: 1, 16, 256>}]} {
    %c0_i32 = arith.constant 0 : i32
    %c2_i32 = arith.constant 2 : i32
    %0 = arith.addi %c0_i32, %c2_i32 : i32
    %c1_i32 = arith.constant 1 : i32
    scf.for %arg14 = %c0_i32 to %0 step %c1_i32  : i32 {
      %c8_i32 = arith.constant 8 : i32
      %452 = arith.muli %arg14, %c8_i32 : i32
      %453 = tpu.assume_multiple %452, 8 : i32
      %c0_230 = arith.constant 0 : index
      %454 = arith.index_cast %453 : i32 to index
      %c0_231 = arith.constant 0 : index
      %455 = vector.load %arg1[%c0_230, %454, %c0_231] : memref<1x16x256xf32, #tpu.memory_space<vmem>>, vector<1x8x256xf32>
      %456 = vector.shape_cast %455 : vector<1x8x256xf32> to vector<8x256xf32>
      %cst_232 = arith.constant dense<0.000000e+00> : vector<8xf32>
      %457 = vector.multi_reduction <add>, %456, %cst_232 [1] : vector<8x256xf32> to vector<8xf32>
      %458 = vector.shape_cast %457 : vector<8xf32> to vector<8x1xf32>
      %cst_233 = arith.constant 2.560000e+02 : f32
      %459 = vector.broadcast %cst_233 : f32 to vector<8x1xf32>
      %460 = arith.divf %458, %459 : vector<8x1xf32>
      %461 = arith.index_cast %453 : i32 to index
      %c0_234 = arith.constant 0 : index
      %462 = vector.load %arg10[%461, %c0_234] : memref<16x1xf32, #tpu.memory_space<vmem>>, vector<8x1xf32>
      tpu.vector_store %arg10[%461, %c0_234], %460 {strides = array<i32>} : memref<16x1xf32, #tpu.memory_space<vmem>>, vector<8x1xf32>,
      %cst_235 = arith.constant dense<0xFF800000> : vector<8xf32>
      %463 = vector.multi_reduction <maximumf>, %456, %cst_235 [1] : vector<8x256xf32> to vector<8xf32>
      %464 = vector.shape_cast %463 : vector<8xf32> to vector<8x1xf32>
      %465 = arith.index_cast %453 : i32 to index
      %c0_236 = arith.constant 0 : index
      %466 = vector.load %arg11[%465, %c0_236] : memref<16x1xf32, #tpu.memory_space<vmem>>, vector<8x1xf32>
      tpu.vector_store %arg11[%465, %c0_236], %464 {strides = array<i32>} : memref<16x1xf32, #tpu.memory_space<vmem>>, vector<8x1xf32>,
    }
    %c2_i32_0 = arith.constant 2 : i32
    %c0 = arith.constant 0 : index
    %c0_1 = arith.constant 0 : index
    %1 = vector.load %arg10[%c0, %c0_1] : memref<16x1xf32, #tpu.memory_space<vmem>>, vector<16x1xf32>
    %c0_2 = arith.constant 0 : index
    %c0_3 = arith.constant 0 : index
    %2 = vector.load %arg2[%c0_2, %c0_3] : memref<2x16xf32, #tpu.memory_space<vmem>>, vector<2x16xf32>
    %cst = arith.constant dense<0.000000e+00> : vector<2x1xf32>
    %3 = tpu.matmul %2, %1, %cst {dimension_numbers = #tpu.dot_dimension_numbers<[1], [0], [0], [1], [0, 0, 1, 1], [], []>} : vector<2x16xf32>, vector<16x1xf32>, vector<2x1xf32> -> vector<2x1xf32>
    %c0_4 = arith.constant 0 : index
    %c0_5 = arith.constant 0 : index
    %4 = vector.load %arg3[%c0_4, %c0_5] : memref<2x1xf32, #tpu.memory_space<vmem>>, vector<2x1xf32>
    %5 = arith.addf %3, %4 : vector<2x1xf32>
    %cst_6 = arith.constant 0.000000e+00 : f32
    %6 = vector.broadcast %cst_6 : f32 to vector<2x1xf32>
    %7 = arith.maximumf %5, %6 : vector<2x1xf32>
    %c0_7 = arith.constant 0 : index
    %c0_8 = arith.constant 0 : index
    %8 = vector.load %arg4[%c0_7, %c0_8] : memref<16x2xf32, #tpu.memory_space<vmem>>, vector<16x2xf32>
    %cst_9 = arith.constant dense<0.000000e+00> : vector<16x1xf32>
    %9 = tpu.matmul %8, %7, %cst_9 {dimension_numbers = #tpu.dot_dimension_numbers<[1], [0], [0], [1], [0, 0, 1, 1], [], []>} : vector<16x2xf32>, vector<2x1xf32>, vector<16x1xf32> -> vector<16x1xf32>
    %c0_10 = arith.constant 0 : index
    %c0_11 = arith.constant 0 : index
    %10 = vector.load %arg5[%c0_10, %c0_11] : memref<16x1xf32, #tpu.memory_space<vmem>>, vector<16x1xf32>
    %11 = arith.addf %9, %10 : vector<16x1xf32>
    %c0_12 = arith.constant 0 : index
    %c0_13 = arith.constant 0 : index
    %12 = vector.load %arg11[%c0_12, %c0_13] : memref<16x1xf32, #tpu.memory_space<vmem>>, vector<16x1xf32>
    %c0_14 = arith.constant 0 : index
    %c0_15 = arith.constant 0 : index
    %13 = vector.load %arg2[%c0_14, %c0_15] : memref<2x16xf32, #tpu.memory_space<vmem>>, vector<2x16xf32>
    %cst_16 = arith.constant dense<0.000000e+00> : vector<2x1xf32>
    %14 = tpu.matmul %13, %12, %cst_16 {dimension_numbers = #tpu.dot_dimension_numbers<[1], [0], [0], [1], [0, 0, 1, 1], [], []>} : vector<2x16xf32>, vector<16x1xf32>, vector<2x1xf32> -> vector<2x1xf32>
    %c0_17 = arith.constant 0 : index
    %c0_18 = arith.constant 0 : index
    %15 = vector.load %arg3[%c0_17, %c0_18] : memref<2x1xf32, #tpu.memory_space<vmem>>, vector<2x1xf32>
    %16 = arith.addf %14, %15 : vector<2x1xf32>
    %cst_19 = arith.constant 0.000000e+00 : f32
    %17 = vector.broadcast %cst_19 : f32 to vector<2x1xf32>
    %18 = arith.maximumf %16, %17 : vector<2x1xf32>
    %c0_20 = arith.constant 0 : index
    %c0_21 = arith.constant 0 : index
    %19 = vector.load %arg4[%c0_20, %c0_21] : memref<16x2xf32, #tpu.memory_space<vmem>>, vector<16x2xf32>
    %cst_22 = arith.constant dense<0.000000e+00> : vector<16x1xf32>
    %20 = tpu.matmul %19, %18, %cst_22 {dimension_numbers = #tpu.dot_dimension_numbers<[1], [0], [0], [1], [0, 0, 1, 1], [], []>} : vector<16x2xf32>, vector<2x1xf32>, vector<16x1xf32> -> vector<16x1xf32>
    %c0_23 = arith.constant 0 : index
    %c0_24 = arith.constant 0 : index
    %21 = vector.load %arg5[%c0_23, %c0_24] : memref<16x1xf32, #tpu.memory_space<vmem>>, vector<16x1xf32>
    %22 = arith.addf %20, %21 : vector<16x1xf32>
    %23 = arith.addf %11, %22 : vector<16x1xf32>
    %24 = arith.negf %23 : vector<16x1xf32>
    %25 = math.exp %24 : vector<16x1xf32>
    %cst_25 = arith.constant 1.000000e+00 : f32
    %26 = vector.broadcast %cst_25 : f32 to vector<16x1xf32>
    %27 = arith.addf %26, %25 : vector<16x1xf32>
    %28 = arith.divf %26, %27 : vector<16x1xf32>
    %c0_26 = arith.constant 0 : index
    %c0_27 = arith.constant 0 : index
    %29 = vector.load %arg12[%c0_26, %c0_27] : memref<16x1xf32, #tpu.memory_space<vmem>>, vector<16x1xf32>
    tpu.vector_store %arg12[%c0_26, %c0_27], %28 {strides = array<i32>} : memref<16x1xf32, #tpu.memory_space<vmem>>, vector<16x1xf32>,
    %cst_28 = arith.constant 0.000000e+00 : f32
    %30 = vector.broadcast %cst_28 : f32 to vector<1x256xf32>
    %cst_29 = arith.constant 0xFF800000 : f32
    %31 = vector.broadcast %cst_29 : f32 to vector<1x256xf32>
    %c0_i32_30 = arith.constant 0 : i32
    %c2_i32_31 = arith.constant 2 : i32
    %32 = arith.addi %c0_i32_30, %c2_i32_31 : i32
    %c1_i32_32 = arith.constant 1 : i32
    %33:2 = scf.for %arg14 = %c0_i32_30 to %32 step %c1_i32_32 iter_args(%arg15 = %30, %arg16 = %31) -> (vector<1x256xf32>, vector<1x256xf32>)  : i32 {
      %c8_i32 = arith.constant 8 : i32
      %452 = arith.muli %arg14, %c8_i32 : i32
      %453 = tpu.assume_multiple %452, 8 : i32
      %c0_230 = arith.constant 0 : index
      %454 = arith.index_cast %453 : i32 to index
      %c0_231 = arith.constant 0 : index
      %455 = vector.load %arg1[%c0_230, %454, %c0_231] : memref<1x16x256xf32, #tpu.memory_space<vmem>>, vector<1x8x256xf32>
      %456 = vector.shape_cast %455 : vector<1x8x256xf32> to vector<8x256xf32>
      %457 = arith.index_cast %453 : i32 to index
      %c0_232 = arith.constant 0 : index
      %458 = vector.load %arg12[%457, %c0_232] : memref<16x1xf32, #tpu.memory_space<vmem>>, vector<8x1xf32>
      %459 = vector.broadcast %458 : vector<8x1xf32> to vector<8x256xf32>
      %460 = arith.mulf %456, %459 : vector<8x256xf32>
      %cst_233 = arith.constant dense<0.000000e+00> : vector<256xf32>
      %461 = vector.multi_reduction <add>, %460, %cst_233 [0] : vector<8x256xf32> to vector<256xf32>
      %462 = vector.shape_cast %461 : vector<256xf32> to vector<1x256xf32>
      %463 = arith.addf %arg15, %462 : vector<1x256xf32>
      %cst_234 = arith.constant dense<0xFF800000> : vector<256xf32>
      %464 = vector.multi_reduction <maximumf>, %460, %cst_234 [0] : vector<8x256xf32> to vector<256xf32>
      %465 = vector.shape_cast %464 : vector<256xf32> to vector<1x256xf32>
      %466 = arith.maximumf %arg16, %465 : vector<1x256xf32>
      scf.yield %463, %466 : vector<1x256xf32>, vector<1x256xf32>
    }
    %c2_i32_33 = arith.constant 2 : i32
    %34 = tpu.iota {dimensions = array<i32: 0>} : vector<2x256xi32>
    %c0_i32_34 = arith.constant 0 : i32
    %35 = vector.broadcast %c0_i32_34 : i32 to vector<2x256xi32>
    %36 = arith.cmpi eq, %34, %35 : vector<2x256xi32>
    %cst_35 = arith.constant 6.250000e-02 : f32
    %37 = vector.broadcast %cst_35 : f32 to vector<1x256xf32>
    %38 = arith.mulf %33#0, %37 : vector<1x256xf32>
    %39 = vector.shape_cast %38 : vector<1x256xf32> to vector<1x256xf32>
    %40 = vector.broadcast %39 : vector<1x256xf32> to vector<2x256xf32>
    %41 = vector.shape_cast %33#1 : vector<1x256xf32> to vector<1x256xf32>
    %42 = vector.broadcast %41 : vector<1x256xf32> to vector<2x256xf32>
    %43 = arith.select %36, %40, %42 : vector<2x256xi1>, vector<2x256xf32>
    %44 = tpu.iota {dimensions = array<i32: 1>} : vector<2x256xi32>
    %cst_36 = arith.constant 0.000000e+00 : f32
    %45 = vector.broadcast %cst_36 : f32 to vector<2x256xf32>
    %c48_i32 = arith.constant 48 : i32
    %46 = tpu.dynamic_rotate %43 by %c48_i32 dim 1 : vector<2x256xf32>, i32 -> vector<2x256xf32>
    %c48_i32_37 = arith.constant 48 : i32
    %47 = vector.broadcast %c48_i32_37 : i32 to vector<2x256xi32>
    %48 = arith.cmpi sge, %44, %47 : vector<2x256xi32>
    %cst_38 = arith.constant 0.000000e+00 : f32
    %49 = vector.broadcast %cst_38 : f32 to vector<2x256xf32>
    %50 = arith.select %48, %46, %49 : vector<2x256xi1>, vector<2x256xf32>
    %c3_i32 = arith.constant 3 : i32
    %51 = tpu.dynamic_rotate %50 by %c3_i32 dim 1 : vector<2x256xf32>, i32 -> vector<2x256xf32>
    %c0_39 = arith.constant 0 : index
    %c0_40 = arith.constant 0 : index
    %52 = vector.load %arg7[%c0_39, %c0_40] : memref<7x256xf32, #tpu.memory_space<vmem>>, vector<1x256xf32>
    %53 = vector.broadcast %52 : vector<1x256xf32> to vector<2x256xf32>
    %54 = arith.mulf %51, %53 : vector<2x256xf32>
    %c0_41 = arith.constant 0 : index
    %c0_42 = arith.constant 0 : index
    %55 = vector.load %arg6[%c0_41, %c0_42] : memref<2x49xf32, #tpu.memory_space<vmem>>, vector<2x1xf32>
    %56 = vector.broadcast %55 : vector<2x1xf32> to vector<2x256xf32>
    %57 = arith.mulf %54, %56 : vector<2x256xf32>
    %58 = arith.addf %45, %57 : vector<2x256xf32>
    %c2_i32_43 = arith.constant 2 : i32
    %59 = tpu.dynamic_rotate %50 by %c2_i32_43 dim 1 : vector<2x256xf32>, i32 -> vector<2x256xf32>
    %c1 = arith.constant 1 : index
    %c0_44 = arith.constant 0 : index
    %60 = vector.load %arg7[%c1, %c0_44] : memref<7x256xf32, #tpu.memory_space<vmem>>, vector<1x256xf32>
    %61 = vector.broadcast %60 : vector<1x256xf32> to vector<2x256xf32>
    %62 = arith.mulf %59, %61 : vector<2x256xf32>
    %c0_45 = arith.constant 0 : index
    %c1_46 = arith.constant 1 : index
    %63 = vector.load %arg6[%c0_45, %c1_46] : memref<2x49xf32, #tpu.memory_space<vmem>>, vector<2x1xf32>
    %64 = vector.broadcast %63 : vector<2x1xf32> to vector<2x256xf32>
    %65 = arith.mulf %62, %64 : vector<2x256xf32>
    %66 = arith.addf %58, %65 : vector<2x256xf32>
    %c1_i32_47 = arith.constant 1 : i32
    %67 = tpu.dynamic_rotate %50 by %c1_i32_47 dim 1 : vector<2x256xf32>, i32 -> vector<2x256xf32>
    %c2 = arith.constant 2 : index
    %c0_48 = arith.constant 0 : index
    %68 = vector.load %arg7[%c2, %c0_48] : memref<7x256xf32, #tpu.memory_space<vmem>>, vector<1x256xf32>
    %69 = vector.broadcast %68 : vector<1x256xf32> to vector<2x256xf32>
    %70 = arith.mulf %67, %69 : vector<2x256xf32>
    %c0_49 = arith.constant 0 : index
    %c2_50 = arith.constant 2 : index
    %71 = vector.load %arg6[%c0_49, %c2_50] : memref<2x49xf32, #tpu.memory_space<vmem>>, vector<2x1xf32>
    %72 = vector.broadcast %71 : vector<2x1xf32> to vector<2x256xf32>
    %73 = arith.mulf %70, %72 : vector<2x256xf32>
    %74 = arith.addf %66, %73 : vector<2x256xf32>
    %c0_51 = arith.constant 0 : index
    %c3 = arith.constant 3 : index
    %75 = vector.load %arg6[%c0_51, %c3] : memref<2x49xf32, #tpu.memory_space<vmem>>, vector<2x1xf32>
    %76 = vector.broadcast %75 : vector<2x1xf32> to vector<2x256xf32>
    %77 = arith.mulf %50, %76 : vector<2x256xf32>
    %78 = arith.addf %74, %77 : vector<2x256xf32>
    %c255_i32 = arith.constant 255 : i32
    %79 = tpu.dynamic_rotate %50 by %c255_i32 dim 1 : vector<2x256xf32>, i32 -> vector<2x256xf32>
    %c4 = arith.constant 4 : index
    %c0_52 = arith.constant 0 : index
    %80 = vector.load %arg7[%c4, %c0_52] : memref<7x256xf32, #tpu.memory_space<vmem>>, vector<1x256xf32>
    %81 = vector.broadcast %80 : vector<1x256xf32> to vector<2x256xf32>
    %82 = arith.mulf %79, %81 : vector<2x256xf32>
    %c0_53 = arith.constant 0 : index
    %c4_54 = arith.constant 4 : index
    %83 = vector.load %arg6[%c0_53, %c4_54] : memref<2x49xf32, #tpu.memory_space<vmem>>, vector<2x1xf32>
    %84 = vector.broadcast %83 : vector<2x1xf32> to vector<2x256xf32>
    %85 = arith.mulf %82, %84 : vector<2x256xf32>
    %86 = arith.addf %78, %85 : vector<2x256xf32>
    %c254_i32 = arith.constant 254 : i32
    %87 = tpu.dynamic_rotate %50 by %c254_i32 dim 1 : vector<2x256xf32>, i32 -> vector<2x256xf32>
    %c5 = arith.constant 5 : index
    %c0_55 = arith.constant 0 : index
    %88 = vector.load %arg7[%c5, %c0_55] : memref<7x256xf32, #tpu.memory_space<vmem>>, vector<1x256xf32>
    %89 = vector.broadcast %88 : vector<1x256xf32> to vector<2x256xf32>
    %90 = arith.mulf %87, %89 : vector<2x256xf32>
    %c0_56 = arith.constant 0 : index
    %c5_57 = arith.constant 5 : index
    %91 = vector.load %arg6[%c0_56, %c5_57] : memref<2x49xf32, #tpu.memory_space<vmem>>, vector<2x1xf32>
    %92 = vector.broadcast %91 : vector<2x1xf32> to vector<2x256xf32>
    %93 = arith.mulf %90, %92 : vector<2x256xf32>
    %94 = arith.addf %86, %93 : vector<2x256xf32>
    %c253_i32 = arith.constant 253 : i32
    %95 = tpu.dynamic_rotate %50 by %c253_i32 dim 1 : vector<2x256xf32>, i32 -> vector<2x256xf32>
    %c6 = arith.constant 6 : index
    %c0_58 = arith.constant 0 : index
    %96 = vector.load %arg7[%c6, %c0_58] : memref<7x256xf32, #tpu.memory_space<vmem>>, vector<1x256xf32>
    %97 = vector.broadcast %96 : vector<1x256xf32> to vector<2x256xf32>
    %98 = arith.mulf %95, %97 : vector<2x256xf32>
    %c0_59 = arith.constant 0 : index
    %c6_60 = arith.constant 6 : index
    %99 = vector.load %arg6[%c0_59, %c6_60] : memref<2x49xf32, #tpu.memory_space<vmem>>, vector<2x1xf32>
    %100 = vector.broadcast %99 : vector<2x1xf32> to vector<2x256xf32>
    %101 = arith.mulf %98, %100 : vector<2x256xf32>
    %102 = arith.addf %94, %101 : vector<2x256xf32>
    %c32_i32 = arith.constant 32 : i32
    %103 = tpu.dynamic_rotate %43 by %c32_i32 dim 1 : vector<2x256xf32>, i32 -> vector<2x256xf32>
    %c32_i32_61 = arith.constant 32 : i32
    %104 = vector.broadcast %c32_i32_61 : i32 to vector<2x256xi32>
    %105 = arith.cmpi sge, %44, %104 : vector<2x256xi32>
    %cst_62 = arith.constant 0.000000e+00 : f32
    %106 = vector.broadcast %cst_62 : f32 to vector<2x256xf32>
    %107 = arith.select %105, %103, %106 : vector<2x256xi1>, vector<2x256xf32>
    %c3_i32_63 = arith.constant 3 : i32
    %108 = tpu.dynamic_rotate %107 by %c3_i32_63 dim 1 : vector<2x256xf32>, i32 -> vector<2x256xf32>
    %c0_64 = arith.constant 0 : index
    %c0_65 = arith.constant 0 : index
    %109 = vector.load %arg7[%c0_64, %c0_65] : memref<7x256xf32, #tpu.memory_space<vmem>>, vector<1x256xf32>
    %110 = vector.broadcast %109 : vector<1x256xf32> to vector<2x256xf32>
    %111 = arith.mulf %108, %110 : vector<2x256xf32>
    %c0_66 = arith.constant 0 : index
    %c7 = arith.constant 7 : index
    %112 = vector.load %arg6[%c0_66, %c7] : memref<2x49xf32, #tpu.memory_space<vmem>>, vector<2x1xf32>
    %113 = vector.broadcast %112 : vector<2x1xf32> to vector<2x256xf32>
    %114 = arith.mulf %111, %113 : vector<2x256xf32>
    %115 = arith.addf %102, %114 : vector<2x256xf32>
    %c2_i32_67 = arith.constant 2 : i32
    %116 = tpu.dynamic_rotate %107 by %c2_i32_67 dim 1 : vector<2x256xf32>, i32 -> vector<2x256xf32>
    %c1_68 = arith.constant 1 : index
    %c0_69 = arith.constant 0 : index
    %117 = vector.load %arg7[%c1_68, %c0_69] : memref<7x256xf32, #tpu.memory_space<vmem>>, vector<1x256xf32>
    %118 = vector.broadcast %117 : vector<1x256xf32> to vector<2x256xf32>
    %119 = arith.mulf %116, %118 : vector<2x256xf32>
    %c0_70 = arith.constant 0 : index
    %c8 = arith.constant 8 : index
    %120 = vector.load %arg6[%c0_70, %c8] : memref<2x49xf32, #tpu.memory_space<vmem>>, vector<2x1xf32>
    %121 = vector.broadcast %120 : vector<2x1xf32> to vector<2x256xf32>
    %122 = arith.mulf %119, %121 : vector<2x256xf32>
    %123 = arith.addf %115, %122 : vector<2x256xf32>
    %c1_i32_71 = arith.constant 1 : i32
    %124 = tpu.dynamic_rotate %107 by %c1_i32_71 dim 1 : vector<2x256xf32>, i32 -> vector<2x256xf32>
    %c2_72 = arith.constant 2 : index
    %c0_73 = arith.constant 0 : index
    %125 = vector.load %arg7[%c2_72, %c0_73] : memref<7x256xf32, #tpu.memory_space<vmem>>, vector<1x256xf32>
    %126 = vector.broadcast %125 : vector<1x256xf32> to vector<2x256xf32>
    %127 = arith.mulf %124, %126 : vector<2x256xf32>
    %c0_74 = arith.constant 0 : index
    %c9 = arith.constant 9 : index
    %128 = vector.load %arg6[%c0_74, %c9] : memref<2x49xf32, #tpu.memory_space<vmem>>, vector<2x1xf32>
    %129 = vector.broadcast %128 : vector<2x1xf32> to vector<2x256xf32>
    %130 = arith.mulf %127, %129 : vector<2x256xf32>
    %131 = arith.addf %123, %130 : vector<2x256xf32>
    %c0_75 = arith.constant 0 : index
    %c10 = arith.constant 10 : index
    %132 = vector.load %arg6[%c0_75, %c10] : memref<2x49xf32, #tpu.memory_space<vmem>>, vector<2x1xf32>
    %133 = vector.broadcast %132 : vector<2x1xf32> to vector<2x256xf32>
    %134 = arith.mulf %107, %133 : vector<2x256xf32>
    %135 = arith.addf %131, %134 : vector<2x256xf32>
    %c255_i32_76 = arith.constant 255 : i32
    %136 = tpu.dynamic_rotate %107 by %c255_i32_76 dim 1 : vector<2x256xf32>, i32 -> vector<2x256xf32>
    %c4_77 = arith.constant 4 : index
    %c0_78 = arith.constant 0 : index
    %137 = vector.load %arg7[%c4_77, %c0_78] : memref<7x256xf32, #tpu.memory_space<vmem>>, vector<1x256xf32>
    %138 = vector.broadcast %137 : vector<1x256xf32> to vector<2x256xf32>
    %139 = arith.mulf %136, %138 : vector<2x256xf32>
    %c0_79 = arith.constant 0 : index
    %c11 = arith.constant 11 : index
    %140 = vector.load %arg6[%c0_79, %c11] : memref<2x49xf32, #tpu.memory_space<vmem>>, vector<2x1xf32>
    %141 = vector.broadcast %140 : vector<2x1xf32> to vector<2x256xf32>
    %142 = arith.mulf %139, %141 : vector<2x256xf32>
    %143 = arith.addf %135, %142 : vector<2x256xf32>
    %c254_i32_80 = arith.constant 254 : i32
    %144 = tpu.dynamic_rotate %107 by %c254_i32_80 dim 1 : vector<2x256xf32>, i32 -> vector<2x256xf32>
    %c5_81 = arith.constant 5 : index
    %c0_82 = arith.constant 0 : index
    %145 = vector.load %arg7[%c5_81, %c0_82] : memref<7x256xf32, #tpu.memory_space<vmem>>, vector<1x256xf32>
    %146 = vector.broadcast %145 : vector<1x256xf32> to vector<2x256xf32>
    %147 = arith.mulf %144, %146 : vector<2x256xf32>
    %c0_83 = arith.constant 0 : index
    %c12 = arith.constant 12 : index
    %148 = vector.load %arg6[%c0_83, %c12] : memref<2x49xf32, #tpu.memory_space<vmem>>, vector<2x1xf32>
    %149 = vector.broadcast %148 : vector<2x1xf32> to vector<2x256xf32>
    %150 = arith.mulf %147, %149 : vector<2x256xf32>
    %151 = arith.addf %143, %150 : vector<2x256xf32>
    %c253_i32_84 = arith.constant 253 : i32
    %152 = tpu.dynamic_rotate %107 by %c253_i32_84 dim 1 : vector<2x256xf32>, i32 -> vector<2x256xf32>
    %c6_85 = arith.constant 6 : index
    %c0_86 = arith.constant 0 : index
    %153 = vector.load %arg7[%c6_85, %c0_86] : memref<7x256xf32, #tpu.memory_space<vmem>>, vector<1x256xf32>
    %154 = vector.broadcast %153 : vector<1x256xf32> to vector<2x256xf32>
    %155 = arith.mulf %152, %154 : vector<2x256xf32>
    %c0_87 = arith.constant 0 : index
    %c13 = arith.constant 13 : index
    %156 = vector.load %arg6[%c0_87, %c13] : memref<2x49xf32, #tpu.memory_space<vmem>>, vector<2x1xf32>
    %157 = vector.broadcast %156 : vector<2x1xf32> to vector<2x256xf32>
    %158 = arith.mulf %155, %157 : vector<2x256xf32>
    %159 = arith.addf %151, %158 : vector<2x256xf32>
    %c16_i32 = arith.constant 16 : i32
    %160 = tpu.dynamic_rotate %43 by %c16_i32 dim 1 : vector<2x256xf32>, i32 -> vector<2x256xf32>
    %c16_i32_88 = arith.constant 16 : i32
    %161 = vector.broadcast %c16_i32_88 : i32 to vector<2x256xi32>
    %162 = arith.cmpi sge, %44, %161 : vector<2x256xi32>
    %cst_89 = arith.constant 0.000000e+00 : f32
    %163 = vector.broadcast %cst_89 : f32 to vector<2x256xf32>
    %164 = arith.select %162, %160, %163 : vector<2x256xi1>, vector<2x256xf32>
    %c3_i32_90 = arith.constant 3 : i32
    %165 = tpu.dynamic_rotate %164 by %c3_i32_90 dim 1 : vector<2x256xf32>, i32 -> vector<2x256xf32>
    %c0_91 = arith.constant 0 : index
    %c0_92 = arith.constant 0 : index
    %166 = vector.load %arg7[%c0_91, %c0_92] : memref<7x256xf32, #tpu.memory_space<vmem>>, vector<1x256xf32>
    %167 = vector.broadcast %166 : vector<1x256xf32> to vector<2x256xf32>
    %168 = arith.mulf %165, %167 : vector<2x256xf32>
    %c0_93 = arith.constant 0 : index
    %c14 = arith.constant 14 : index
    %169 = vector.load %arg6[%c0_93, %c14] : memref<2x49xf32, #tpu.memory_space<vmem>>, vector<2x1xf32>
    %170 = vector.broadcast %169 : vector<2x1xf32> to vector<2x256xf32>
    %171 = arith.mulf %168, %170 : vector<2x256xf32>
    %172 = arith.addf %159, %171 : vector<2x256xf32>
    %c2_i32_94 = arith.constant 2 : i32
    %173 = tpu.dynamic_rotate %164 by %c2_i32_94 dim 1 : vector<2x256xf32>, i32 -> vector<2x256xf32>
    %c1_95 = arith.constant 1 : index
    %c0_96 = arith.constant 0 : index
    %174 = vector.load %arg7[%c1_95, %c0_96] : memref<7x256xf32, #tpu.memory_space<vmem>>, vector<1x256xf32>
    %175 = vector.broadcast %174 : vector<1x256xf32> to vector<2x256xf32>
    %176 = arith.mulf %173, %175 : vector<2x256xf32>
    %c0_97 = arith.constant 0 : index
    %c15 = arith.constant 15 : index
    %177 = vector.load %arg6[%c0_97, %c15] : memref<2x49xf32, #tpu.memory_space<vmem>>, vector<2x1xf32>
    %178 = vector.broadcast %177 : vector<2x1xf32> to vector<2x256xf32>
    %179 = arith.mulf %176, %178 : vector<2x256xf32>
    %180 = arith.addf %172, %179 : vector<2x256xf32>
    %c1_i32_98 = arith.constant 1 : i32
    %181 = tpu.dynamic_rotate %164 by %c1_i32_98 dim 1 : vector<2x256xf32>, i32 -> vector<2x256xf32>
    %c2_99 = arith.constant 2 : index
    %c0_100 = arith.constant 0 : index
    %182 = vector.load %arg7[%c2_99, %c0_100] : memref<7x256xf32, #tpu.memory_space<vmem>>, vector<1x256xf32>
    %183 = vector.broadcast %182 : vector<1x256xf32> to vector<2x256xf32>
    %184 = arith.mulf %181, %183 : vector<2x256xf32>
    %c0_101 = arith.constant 0 : index
    %c16 = arith.constant 16 : index
    %185 = vector.load %arg6[%c0_101, %c16] : memref<2x49xf32, #tpu.memory_space<vmem>>, vector<2x1xf32>
    %186 = vector.broadcast %185 : vector<2x1xf32> to vector<2x256xf32>
    %187 = arith.mulf %184, %186 : vector<2x256xf32>
    %188 = arith.addf %180, %187 : vector<2x256xf32>
    %c0_102 = arith.constant 0 : index
    %c17 = arith.constant 17 : index
    %189 = vector.load %arg6[%c0_102, %c17] : memref<2x49xf32, #tpu.memory_space<vmem>>, vector<2x1xf32>
    %190 = vector.broadcast %189 : vector<2x1xf32> to vector<2x256xf32>
    %191 = arith.mulf %164, %190 : vector<2x256xf32>
    %192 = arith.addf %188, %191 : vector<2x256xf32>
    %c255_i32_103 = arith.constant 255 : i32
    %193 = tpu.dynamic_rotate %164 by %c255_i32_103 dim 1 : vector<2x256xf32>, i32 -> vector<2x256xf32>
    %c4_104 = arith.constant 4 : index
    %c0_105 = arith.constant 0 : index
    %194 = vector.load %arg7[%c4_104, %c0_105] : memref<7x256xf32, #tpu.memory_space<vmem>>, vector<1x256xf32>
    %195 = vector.broadcast %194 : vector<1x256xf32> to vector<2x256xf32>
    %196 = arith.mulf %193, %195 : vector<2x256xf32>
    %c0_106 = arith.constant 0 : index
    %c18 = arith.constant 18 : index
    %197 = vector.load %arg6[%c0_106, %c18] : memref<2x49xf32, #tpu.memory_space<vmem>>, vector<2x1xf32>
    %198 = vector.broadcast %197 : vector<2x1xf32> to vector<2x256xf32>
    %199 = arith.mulf %196, %198 : vector<2x256xf32>
    %200 = arith.addf %192, %199 : vector<2x256xf32>
    %c254_i32_107 = arith.constant 254 : i32
    %201 = tpu.dynamic_rotate %164 by %c254_i32_107 dim 1 : vector<2x256xf32>, i32 -> vector<2x256xf32>
    %c5_108 = arith.constant 5 : index
    %c0_109 = arith.constant 0 : index
    %202 = vector.load %arg7[%c5_108, %c0_109] : memref<7x256xf32, #tpu.memory_space<vmem>>, vector<1x256xf32>
    %203 = vector.broadcast %202 : vector<1x256xf32> to vector<2x256xf32>
    %204 = arith.mulf %201, %203 : vector<2x256xf32>
    %c0_110 = arith.constant 0 : index
    %c19 = arith.constant 19 : index
    %205 = vector.load %arg6[%c0_110, %c19] : memref<2x49xf32, #tpu.memory_space<vmem>>, vector<2x1xf32>
    %206 = vector.broadcast %205 : vector<2x1xf32> to vector<2x256xf32>
    %207 = arith.mulf %204, %206 : vector<2x256xf32>
    %208 = arith.addf %200, %207 : vector<2x256xf32>
    %c253_i32_111 = arith.constant 253 : i32
    %209 = tpu.dynamic_rotate %164 by %c253_i32_111 dim 1 : vector<2x256xf32>, i32 -> vector<2x256xf32>
    %c6_112 = arith.constant 6 : index
    %c0_113 = arith.constant 0 : index
    %210 = vector.load %arg7[%c6_112, %c0_113] : memref<7x256xf32, #tpu.memory_space<vmem>>, vector<1x256xf32>
    %211 = vector.broadcast %210 : vector<1x256xf32> to vector<2x256xf32>
    %212 = arith.mulf %209, %211 : vector<2x256xf32>
    %c0_114 = arith.constant 0 : index
    %c20 = arith.constant 20 : index
    %213 = vector.load %arg6[%c0_114, %c20] : memref<2x49xf32, #tpu.memory_space<vmem>>, vector<2x1xf32>
    %214 = vector.broadcast %213 : vector<2x1xf32> to vector<2x256xf32>
    %215 = arith.mulf %212, %214 : vector<2x256xf32>
    %216 = arith.addf %208, %215 : vector<2x256xf32>
    %c3_i32_115 = arith.constant 3 : i32
    %217 = tpu.dynamic_rotate %43 by %c3_i32_115 dim 1 : vector<2x256xf32>, i32 -> vector<2x256xf32>
    %c0_116 = arith.constant 0 : index
    %c0_117 = arith.constant 0 : index
    %218 = vector.load %arg7[%c0_116, %c0_117] : memref<7x256xf32, #tpu.memory_space<vmem>>, vector<1x256xf32>
    %219 = vector.broadcast %218 : vector<1x256xf32> to vector<2x256xf32>
    %220 = arith.mulf %217, %219 : vector<2x256xf32>
    %c0_118 = arith.constant 0 : index
    %c21 = arith.constant 21 : index
    %221 = vector.load %arg6[%c0_118, %c21] : memref<2x49xf32, #tpu.memory_space<vmem>>, vector<2x1xf32>
    %222 = vector.broadcast %221 : vector<2x1xf32> to vector<2x256xf32>
    %223 = arith.mulf %220, %222 : vector<2x256xf32>
    %224 = arith.addf %216, %223 : vector<2x256xf32>
    %c2_i32_119 = arith.constant 2 : i32
    %225 = tpu.dynamic_rotate %43 by %c2_i32_119 dim 1 : vector<2x256xf32>, i32 -> vector<2x256xf32>
    %c1_120 = arith.constant 1 : index
    %c0_121 = arith.constant 0 : index
    %226 = vector.load %arg7[%c1_120, %c0_121] : memref<7x256xf32, #tpu.memory_space<vmem>>, vector<1x256xf32>
    %227 = vector.broadcast %226 : vector<1x256xf32> to vector<2x256xf32>
    %228 = arith.mulf %225, %227 : vector<2x256xf32>
    %c0_122 = arith.constant 0 : index
    %c22 = arith.constant 22 : index
    %229 = vector.load %arg6[%c0_122, %c22] : memref<2x49xf32, #tpu.memory_space<vmem>>, vector<2x1xf32>
    %230 = vector.broadcast %229 : vector<2x1xf32> to vector<2x256xf32>
    %231 = arith.mulf %228, %230 : vector<2x256xf32>
    %232 = arith.addf %224, %231 : vector<2x256xf32>
    %c1_i32_123 = arith.constant 1 : i32
    %233 = tpu.dynamic_rotate %43 by %c1_i32_123 dim 1 : vector<2x256xf32>, i32 -> vector<2x256xf32>
    %c2_124 = arith.constant 2 : index
    %c0_125 = arith.constant 0 : index
    %234 = vector.load %arg7[%c2_124, %c0_125] : memref<7x256xf32, #tpu.memory_space<vmem>>, vector<1x256xf32>
    %235 = vector.broadcast %234 : vector<1x256xf32> to vector<2x256xf32>
    %236 = arith.mulf %233, %235 : vector<2x256xf32>
    %c0_126 = arith.constant 0 : index
    %c23 = arith.constant 23 : index
    %237 = vector.load %arg6[%c0_126, %c23] : memref<2x49xf32, #tpu.memory_space<vmem>>, vector<2x1xf32>
    %238 = vector.broadcast %237 : vector<2x1xf32> to vector<2x256xf32>
    %239 = arith.mulf %236, %238 : vector<2x256xf32>
    %240 = arith.addf %232, %239 : vector<2x256xf32>
    %c0_127 = arith.constant 0 : index
    %c24 = arith.constant 24 : index
    %241 = vector.load %arg6[%c0_127, %c24] : memref<2x49xf32, #tpu.memory_space<vmem>>, vector<2x1xf32>
    %242 = vector.broadcast %241 : vector<2x1xf32> to vector<2x256xf32>
    %243 = arith.mulf %43, %242 : vector<2x256xf32>
    %244 = arith.addf %240, %243 : vector<2x256xf32>
    %c255_i32_128 = arith.constant 255 : i32
    %245 = tpu.dynamic_rotate %43 by %c255_i32_128 dim 1 : vector<2x256xf32>, i32 -> vector<2x256xf32>
    %c4_129 = arith.constant 4 : index
    %c0_130 = arith.constant 0 : index
    %246 = vector.load %arg7[%c4_129, %c0_130] : memref<7x256xf32, #tpu.memory_space<vmem>>, vector<1x256xf32>
    %247 = vector.broadcast %246 : vector<1x256xf32> to vector<2x256xf32>
    %248 = arith.mulf %245, %247 : vector<2x256xf32>
    %c0_131 = arith.constant 0 : index
    %c25 = arith.constant 25 : index
    %249 = vector.load %arg6[%c0_131, %c25] : memref<2x49xf32, #tpu.memory_space<vmem>>, vector<2x1xf32>
    %250 = vector.broadcast %249 : vector<2x1xf32> to vector<2x256xf32>
    %251 = arith.mulf %248, %250 : vector<2x256xf32>
    %252 = arith.addf %244, %251 : vector<2x256xf32>
    %c254_i32_132 = arith.constant 254 : i32
    %253 = tpu.dynamic_rotate %43 by %c254_i32_132 dim 1 : vector<2x256xf32>, i32 -> vector<2x256xf32>
    %c5_133 = arith.constant 5 : index
    %c0_134 = arith.constant 0 : index
    %254 = vector.load %arg7[%c5_133, %c0_134] : memref<7x256xf32, #tpu.memory_space<vmem>>, vector<1x256xf32>
    %255 = vector.broadcast %254 : vector<1x256xf32> to vector<2x256xf32>
    %256 = arith.mulf %253, %255 : vector<2x256xf32>
    %c0_135 = arith.constant 0 : index
    %c26 = arith.constant 26 : index
    %257 = vector.load %arg6[%c0_135, %c26] : memref<2x49xf32, #tpu.memory_space<vmem>>, vector<2x1xf32>
    %258 = vector.broadcast %257 : vector<2x1xf32> to vector<2x256xf32>
    %259 = arith.mulf %256, %258 : vector<2x256xf32>
    %260 = arith.addf %252, %259 : vector<2x256xf32>
    %c253_i32_136 = arith.constant 253 : i32
    %261 = tpu.dynamic_rotate %43 by %c253_i32_136 dim 1 : vector<2x256xf32>, i32 -> vector<2x256xf32>
    %c6_137 = arith.constant 6 : index
    %c0_138 = arith.constant 0 : index
    %262 = vector.load %arg7[%c6_137, %c0_138] : memref<7x256xf32, #tpu.memory_space<vmem>>, vector<1x256xf32>
    %263 = vector.broadcast %262 : vector<1x256xf32> to vector<2x256xf32>
    %264 = arith.mulf %261, %263 : vector<2x256xf32>
    %c0_139 = arith.constant 0 : index
    %c27 = arith.constant 27 : index
    %265 = vector.load %arg6[%c0_139, %c27] : memref<2x49xf32, #tpu.memory_space<vmem>>, vector<2x1xf32>
    %266 = vector.broadcast %265 : vector<2x1xf32> to vector<2x256xf32>
    %267 = arith.mulf %264, %266 : vector<2x256xf32>
    %268 = arith.addf %260, %267 : vector<2x256xf32>
    %c240_i32 = arith.constant 240 : i32
    %269 = tpu.dynamic_rotate %43 by %c240_i32 dim 1 : vector<2x256xf32>, i32 -> vector<2x256xf32>
    %c240_i32_140 = arith.constant 240 : i32
    %270 = vector.broadcast %c240_i32_140 : i32 to vector<2x256xi32>
    %271 = arith.cmpi slt, %44, %270 : vector<2x256xi32>
    %cst_141 = arith.constant 0.000000e+00 : f32
    %272 = vector.broadcast %cst_141 : f32 to vector<2x256xf32>
    %273 = arith.select %271, %269, %272 : vector<2x256xi1>, vector<2x256xf32>
    %c3_i32_142 = arith.constant 3 : i32
    %274 = tpu.dynamic_rotate %273 by %c3_i32_142 dim 1 : vector<2x256xf32>, i32 -> vector<2x256xf32>
    %c0_143 = arith.constant 0 : index
    %c0_144 = arith.constant 0 : index
    %275 = vector.load %arg7[%c0_143, %c0_144] : memref<7x256xf32, #tpu.memory_space<vmem>>, vector<1x256xf32>
    %276 = vector.broadcast %275 : vector<1x256xf32> to vector<2x256xf32>
    %277 = arith.mulf %274, %276 : vector<2x256xf32>
    %c0_145 = arith.constant 0 : index
    %c28 = arith.constant 28 : index
    %278 = vector.load %arg6[%c0_145, %c28] : memref<2x49xf32, #tpu.memory_space<vmem>>, vector<2x1xf32>
    %279 = vector.broadcast %278 : vector<2x1xf32> to vector<2x256xf32>
    %280 = arith.mulf %277, %279 : vector<2x256xf32>
    %281 = arith.addf %268, %280 : vector<2x256xf32>
    %c2_i32_146 = arith.constant 2 : i32
    %282 = tpu.dynamic_rotate %273 by %c2_i32_146 dim 1 : vector<2x256xf32>, i32 -> vector<2x256xf32>
    %c1_147 = arith.constant 1 : index
    %c0_148 = arith.constant 0 : index
    %283 = vector.load %arg7[%c1_147, %c0_148] : memref<7x256xf32, #tpu.memory_space<vmem>>, vector<1x256xf32>
    %284 = vector.broadcast %283 : vector<1x256xf32> to vector<2x256xf32>
    %285 = arith.mulf %282, %284 : vector<2x256xf32>
    %c0_149 = arith.constant 0 : index
    %c29 = arith.constant 29 : index
    %286 = vector.load %arg6[%c0_149, %c29] : memref<2x49xf32, #tpu.memory_space<vmem>>, vector<2x1xf32>
    %287 = vector.broadcast %286 : vector<2x1xf32> to vector<2x256xf32>
    %288 = arith.mulf %285, %287 : vector<2x256xf32>
    %289 = arith.addf %281, %288 : vector<2x256xf32>
    %c1_i32_150 = arith.constant 1 : i32
    %290 = tpu.dynamic_rotate %273 by %c1_i32_150 dim 1 : vector<2x256xf32>, i32 -> vector<2x256xf32>
    %c2_151 = arith.constant 2 : index
    %c0_152 = arith.constant 0 : index
    %291 = vector.load %arg7[%c2_151, %c0_152] : memref<7x256xf32, #tpu.memory_space<vmem>>, vector<1x256xf32>
    %292 = vector.broadcast %291 : vector<1x256xf32> to vector<2x256xf32>
    %293 = arith.mulf %290, %292 : vector<2x256xf32>
    %c0_153 = arith.constant 0 : index
    %c30 = arith.constant 30 : index
    %294 = vector.load %arg6[%c0_153, %c30] : memref<2x49xf32, #tpu.memory_space<vmem>>, vector<2x1xf32>
    %295 = vector.broadcast %294 : vector<2x1xf32> to vector<2x256xf32>
    %296 = arith.mulf %293, %295 : vector<2x256xf32>
    %297 = arith.addf %289, %296 : vector<2x256xf32>
    %c0_154 = arith.constant 0 : index
    %c31 = arith.constant 31 : index
    %298 = vector.load %arg6[%c0_154, %c31] : memref<2x49xf32, #tpu.memory_space<vmem>>, vector<2x1xf32>
    %299 = vector.broadcast %298 : vector<2x1xf32> to vector<2x256xf32>
    %300 = arith.mulf %273, %299 : vector<2x256xf32>
    %301 = arith.addf %297, %300 : vector<2x256xf32>
    %c255_i32_155 = arith.constant 255 : i32
    %302 = tpu.dynamic_rotate %273 by %c255_i32_155 dim 1 : vector<2x256xf32>, i32 -> vector<2x256xf32>
    %c4_156 = arith.constant 4 : index
    %c0_157 = arith.constant 0 : index
    %303 = vector.load %arg7[%c4_156, %c0_157] : memref<7x256xf32, #tpu.memory_space<vmem>>, vector<1x256xf32>
    %304 = vector.broadcast %303 : vector<1x256xf32> to vector<2x256xf32>
    %305 = arith.mulf %302, %304 : vector<2x256xf32>
    %c0_158 = arith.constant 0 : index
    %c32 = arith.constant 32 : index
    %306 = vector.load %arg6[%c0_158, %c32] : memref<2x49xf32, #tpu.memory_space<vmem>>, vector<2x1xf32>
    %307 = vector.broadcast %306 : vector<2x1xf32> to vector<2x256xf32>
    %308 = arith.mulf %305, %307 : vector<2x256xf32>
    %309 = arith.addf %301, %308 : vector<2x256xf32>
    %c254_i32_159 = arith.constant 254 : i32
    %310 = tpu.dynamic_rotate %273 by %c254_i32_159 dim 1 : vector<2x256xf32>, i32 -> vector<2x256xf32>
    %c5_160 = arith.constant 5 : index
    %c0_161 = arith.constant 0 : index
    %311 = vector.load %arg7[%c5_160, %c0_161] : memref<7x256xf32, #tpu.memory_space<vmem>>, vector<1x256xf32>
    %312 = vector.broadcast %311 : vector<1x256xf32> to vector<2x256xf32>
    %313 = arith.mulf %310, %312 : vector<2x256xf32>
    %c0_162 = arith.constant 0 : index
    %c33 = arith.constant 33 : index
    %314 = vector.load %arg6[%c0_162, %c33] : memref<2x49xf32, #tpu.memory_space<vmem>>, vector<2x1xf32>
    %315 = vector.broadcast %314 : vector<2x1xf32> to vector<2x256xf32>
    %316 = arith.mulf %313, %315 : vector<2x256xf32>
    %317 = arith.addf %309, %316 : vector<2x256xf32>
    %c253_i32_163 = arith.constant 253 : i32
    %318 = tpu.dynamic_rotate %273 by %c253_i32_163 dim 1 : vector<2x256xf32>, i32 -> vector<2x256xf32>
    %c6_164 = arith.constant 6 : index
    %c0_165 = arith.constant 0 : index
    %319 = vector.load %arg7[%c6_164, %c0_165] : memref<7x256xf32, #tpu.memory_space<vmem>>, vector<1x256xf32>
    %320 = vector.broadcast %319 : vector<1x256xf32> to vector<2x256xf32>
    %321 = arith.mulf %318, %320 : vector<2x256xf32>
    %c0_166 = arith.constant 0 : index
    %c34 = arith.constant 34 : index
    %322 = vector.load %arg6[%c0_166, %c34] : memref<2x49xf32, #tpu.memory_space<vmem>>, vector<2x1xf32>
    %323 = vector.broadcast %322 : vector<2x1xf32> to vector<2x256xf32>
    %324 = arith.mulf %321, %323 : vector<2x256xf32>
    %325 = arith.addf %317, %324 : vector<2x256xf32>
    %c224_i32 = arith.constant 224 : i32
    %326 = tpu.dynamic_rotate %43 by %c224_i32 dim 1 : vector<2x256xf32>, i32 -> vector<2x256xf32>
    %c224_i32_167 = arith.constant 224 : i32
    %327 = vector.broadcast %c224_i32_167 : i32 to vector<2x256xi32>
    %328 = arith.cmpi slt, %44, %327 : vector<2x256xi32>
    %cst_168 = arith.constant 0.000000e+00 : f32
    %329 = vector.broadcast %cst_168 : f32 to vector<2x256xf32>
    %330 = arith.select %328, %326, %329 : vector<2x256xi1>, vector<2x256xf32>
    %c3_i32_169 = arith.constant 3 : i32
    %331 = tpu.dynamic_rotate %330 by %c3_i32_169 dim 1 : vector<2x256xf32>, i32 -> vector<2x256xf32>
    %c0_170 = arith.constant 0 : index
    %c0_171 = arith.constant 0 : index
    %332 = vector.load %arg7[%c0_170, %c0_171] : memref<7x256xf32, #tpu.memory_space<vmem>>, vector<1x256xf32>
    %333 = vector.broadcast %332 : vector<1x256xf32> to vector<2x256xf32>
    %334 = arith.mulf %331, %333 : vector<2x256xf32>
    %c0_172 = arith.constant 0 : index
    %c35 = arith.constant 35 : index
    %335 = vector.load %arg6[%c0_172, %c35] : memref<2x49xf32, #tpu.memory_space<vmem>>, vector<2x1xf32>
    %336 = vector.broadcast %335 : vector<2x1xf32> to vector<2x256xf32>
    %337 = arith.mulf %334, %336 : vector<2x256xf32>
    %338 = arith.addf %325, %337 : vector<2x256xf32>
    %c2_i32_173 = arith.constant 2 : i32
    %339 = tpu.dynamic_rotate %330 by %c2_i32_173 dim 1 : vector<2x256xf32>, i32 -> vector<2x256xf32>
    %c1_174 = arith.constant 1 : index
    %c0_175 = arith.constant 0 : index
    %340 = vector.load %arg7[%c1_174, %c0_175] : memref<7x256xf32, #tpu.memory_space<vmem>>, vector<1x256xf32>
    %341 = vector.broadcast %340 : vector<1x256xf32> to vector<2x256xf32>
    %342 = arith.mulf %339, %341 : vector<2x256xf32>
    %c0_176 = arith.constant 0 : index
    %c36 = arith.constant 36 : index
    %343 = vector.load %arg6[%c0_176, %c36] : memref<2x49xf32, #tpu.memory_space<vmem>>, vector<2x1xf32>
    %344 = vector.broadcast %343 : vector<2x1xf32> to vector<2x256xf32>
    %345 = arith.mulf %342, %344 : vector<2x256xf32>
    %346 = arith.addf %338, %345 : vector<2x256xf32>
    %c1_i32_177 = arith.constant 1 : i32
    %347 = tpu.dynamic_rotate %330 by %c1_i32_177 dim 1 : vector<2x256xf32>, i32 -> vector<2x256xf32>
    %c2_178 = arith.constant 2 : index
    %c0_179 = arith.constant 0 : index
    %348 = vector.load %arg7[%c2_178, %c0_179] : memref<7x256xf32, #tpu.memory_space<vmem>>, vector<1x256xf32>
    %349 = vector.broadcast %348 : vector<1x256xf32> to vector<2x256xf32>
    %350 = arith.mulf %347, %349 : vector<2x256xf32>
    %c0_180 = arith.constant 0 : index
    %c37 = arith.constant 37 : index
    %351 = vector.load %arg6[%c0_180, %c37] : memref<2x49xf32, #tpu.memory_space<vmem>>, vector<2x1xf32>
    %352 = vector.broadcast %351 : vector<2x1xf32> to vector<2x256xf32>
    %353 = arith.mulf %350, %352 : vector<2x256xf32>
    %354 = arith.addf %346, %353 : vector<2x256xf32>
    %c0_181 = arith.constant 0 : index
    %c38 = arith.constant 38 : index
    %355 = vector.load %arg6[%c0_181, %c38] : memref<2x49xf32, #tpu.memory_space<vmem>>, vector<2x1xf32>
    %356 = vector.broadcast %355 : vector<2x1xf32> to vector<2x256xf32>
    %357 = arith.mulf %330, %356 : vector<2x256xf32>
    %358 = arith.addf %354, %357 : vector<2x256xf32>
    %c255_i32_182 = arith.constant 255 : i32
    %359 = tpu.dynamic_rotate %330 by %c255_i32_182 dim 1 : vector<2x256xf32>, i32 -> vector<2x256xf32>
    %c4_183 = arith.constant 4 : index
    %c0_184 = arith.constant 0 : index
    %360 = vector.load %arg7[%c4_183, %c0_184] : memref<7x256xf32, #tpu.memory_space<vmem>>, vector<1x256xf32>
    %361 = vector.broadcast %360 : vector<1x256xf32> to vector<2x256xf32>
    %362 = arith.mulf %359, %361 : vector<2x256xf32>
    %c0_185 = arith.constant 0 : index
    %c39 = arith.constant 39 : index
    %363 = vector.load %arg6[%c0_185, %c39] : memref<2x49xf32, #tpu.memory_space<vmem>>, vector<2x1xf32>
    %364 = vector.broadcast %363 : vector<2x1xf32> to vector<2x256xf32>
    %365 = arith.mulf %362, %364 : vector<2x256xf32>
    %366 = arith.addf %358, %365 : vector<2x256xf32>
    %c254_i32_186 = arith.constant 254 : i32
    %367 = tpu.dynamic_rotate %330 by %c254_i32_186 dim 1 : vector<2x256xf32>, i32 -> vector<2x256xf32>
    %c5_187 = arith.constant 5 : index
    %c0_188 = arith.constant 0 : index
    %368 = vector.load %arg7[%c5_187, %c0_188] : memref<7x256xf32, #tpu.memory_space<vmem>>, vector<1x256xf32>
    %369 = vector.broadcast %368 : vector<1x256xf32> to vector<2x256xf32>
    %370 = arith.mulf %367, %369 : vector<2x256xf32>
    %c0_189 = arith.constant 0 : index
    %c40 = arith.constant 40 : index
    %371 = vector.load %arg6[%c0_189, %c40] : memref<2x49xf32, #tpu.memory_space<vmem>>, vector<2x1xf32>
    %372 = vector.broadcast %371 : vector<2x1xf32> to vector<2x256xf32>
    %373 = arith.mulf %370, %372 : vector<2x256xf32>
    %374 = arith.addf %366, %373 : vector<2x256xf32>
    %c253_i32_190 = arith.constant 253 : i32
    %375 = tpu.dynamic_rotate %330 by %c253_i32_190 dim 1 : vector<2x256xf32>, i32 -> vector<2x256xf32>
    %c6_191 = arith.constant 6 : index
    %c0_192 = arith.constant 0 : index
    %376 = vector.load %arg7[%c6_191, %c0_192] : memref<7x256xf32, #tpu.memory_space<vmem>>, vector<1x256xf32>
    %377 = vector.broadcast %376 : vector<1x256xf32> to vector<2x256xf32>
    %378 = arith.mulf %375, %377 : vector<2x256xf32>
    %c0_193 = arith.constant 0 : index
    %c41 = arith.constant 41 : index
    %379 = vector.load %arg6[%c0_193, %c41] : memref<2x49xf32, #tpu.memory_space<vmem>>, vector<2x1xf32>
    %380 = vector.broadcast %379 : vector<2x1xf32> to vector<2x256xf32>
    %381 = arith.mulf %378, %380 : vector<2x256xf32>
    %382 = arith.addf %374, %381 : vector<2x256xf32>
    %c208_i32 = arith.constant 208 : i32
    %383 = tpu.dynamic_rotate %43 by %c208_i32 dim 1 : vector<2x256xf32>, i32 -> vector<2x256xf32>
    %c208_i32_194 = arith.constant 208 : i32
    %384 = vector.broadcast %c208_i32_194 : i32 to vector<2x256xi32>
    %385 = arith.cmpi slt, %44, %384 : vector<2x256xi32>
    %cst_195 = arith.constant 0.000000e+00 : f32
    %386 = vector.broadcast %cst_195 : f32 to vector<2x256xf32>
    %387 = arith.select %385, %383, %386 : vector<2x256xi1>, vector<2x256xf32>
    %c3_i32_196 = arith.constant 3 : i32
    %388 = tpu.dynamic_rotate %387 by %c3_i32_196 dim 1 : vector<2x256xf32>, i32 -> vector<2x256xf32>
    %c0_197 = arith.constant 0 : index
    %c0_198 = arith.constant 0 : index
    %389 = vector.load %arg7[%c0_197, %c0_198] : memref<7x256xf32, #tpu.memory_space<vmem>>, vector<1x256xf32>
    %390 = vector.broadcast %389 : vector<1x256xf32> to vector<2x256xf32>
    %391 = arith.mulf %388, %390 : vector<2x256xf32>
    %c0_199 = arith.constant 0 : index
    %c42 = arith.constant 42 : index
    %392 = vector.load %arg6[%c0_199, %c42] : memref<2x49xf32, #tpu.memory_space<vmem>>, vector<2x1xf32>
    %393 = vector.broadcast %392 : vector<2x1xf32> to vector<2x256xf32>
    %394 = arith.mulf %391, %393 : vector<2x256xf32>
    %395 = arith.addf %382, %394 : vector<2x256xf32>
    %c2_i32_200 = arith.constant 2 : i32
    %396 = tpu.dynamic_rotate %387 by %c2_i32_200 dim 1 : vector<2x256xf32>, i32 -> vector<2x256xf32>
    %c1_201 = arith.constant 1 : index
    %c0_202 = arith.constant 0 : index
    %397 = vector.load %arg7[%c1_201, %c0_202] : memref<7x256xf32, #tpu.memory_space<vmem>>, vector<1x256xf32>
    %398 = vector.broadcast %397 : vector<1x256xf32> to vector<2x256xf32>
    %399 = arith.mulf %396, %398 : vector<2x256xf32>
    %c0_203 = arith.constant 0 : index
    %c43 = arith.constant 43 : index
    %400 = vector.load %arg6[%c0_203, %c43] : memref<2x49xf32, #tpu.memory_space<vmem>>, vector<2x1xf32>
    %401 = vector.broadcast %400 : vector<2x1xf32> to vector<2x256xf32>
    %402 = arith.mulf %399, %401 : vector<2x256xf32>
    %403 = arith.addf %395, %402 : vector<2x256xf32>
    %c1_i32_204 = arith.constant 1 : i32
    %404 = tpu.dynamic_rotate %387 by %c1_i32_204 dim 1 : vector<2x256xf32>, i32 -> vector<2x256xf32>
    %c2_205 = arith.constant 2 : index
    %c0_206 = arith.constant 0 : index
    %405 = vector.load %arg7[%c2_205, %c0_206] : memref<7x256xf32, #tpu.memory_space<vmem>>, vector<1x256xf32>
    %406 = vector.broadcast %405 : vector<1x256xf32> to vector<2x256xf32>
    %407 = arith.mulf %404, %406 : vector<2x256xf32>
    %c0_207 = arith.constant 0 : index
    %c44 = arith.constant 44 : index
    %408 = vector.load %arg6[%c0_207, %c44] : memref<2x49xf32, #tpu.memory_space<vmem>>, vector<2x1xf32>
    %409 = vector.broadcast %408 : vector<2x1xf32> to vector<2x256xf32>
    %410 = arith.mulf %407, %409 : vector<2x256xf32>
    %411 = arith.addf %403, %410 : vector<2x256xf32>
    %c0_208 = arith.constant 0 : index
    %c45 = arith.constant 45 : index
    %412 = vector.load %arg6[%c0_208, %c45] : memref<2x49xf32, #tpu.memory_space<vmem>>, vector<2x1xf32>
    %413 = vector.broadcast %412 : vector<2x1xf32> to vector<2x256xf32>
    %414 = arith.mulf %387, %413 : vector<2x256xf32>
    %415 = arith.addf %411, %414 : vector<2x256xf32>
    %c255_i32_209 = arith.constant 255 : i32
    %416 = tpu.dynamic_rotate %387 by %c255_i32_209 dim 1 : vector<2x256xf32>, i32 -> vector<2x256xf32>
    %c4_210 = arith.constant 4 : index
    %c0_211 = arith.constant 0 : index
    %417 = vector.load %arg7[%c4_210, %c0_211] : memref<7x256xf32, #tpu.memory_space<vmem>>, vector<1x256xf32>
    %418 = vector.broadcast %417 : vector<1x256xf32> to vector<2x256xf32>
    %419 = arith.mulf %416, %418 : vector<2x256xf32>
    %c0_212 = arith.constant 0 : index
    %c46 = arith.constant 46 : index
    %420 = vector.load %arg6[%c0_212, %c46] : memref<2x49xf32, #tpu.memory_space<vmem>>, vector<2x1xf32>
    %421 = vector.broadcast %420 : vector<2x1xf32> to vector<2x256xf32>
    %422 = arith.mulf %419, %421 : vector<2x256xf32>
    %423 = arith.addf %415, %422 : vector<2x256xf32>
    %c254_i32_213 = arith.constant 254 : i32
    %424 = tpu.dynamic_rotate %387 by %c254_i32_213 dim 1 : vector<2x256xf32>, i32 -> vector<2x256xf32>
    %c5_214 = arith.constant 5 : index
    %c0_215 = arith.constant 0 : index
    %425 = vector.load %arg7[%c5_214, %c0_215] : memref<7x256xf32, #tpu.memory_space<vmem>>, vector<1x256xf32>
    %426 = vector.broadcast %425 : vector<1x256xf32> to vector<2x256xf32>
    %427 = arith.mulf %424, %426 : vector<2x256xf32>
    %c0_216 = arith.constant 0 : index
    %c47 = arith.constant 47 : index
    %428 = vector.load %arg6[%c0_216, %c47] : memref<2x49xf32, #tpu.memory_space<vmem>>, vector<2x1xf32>
    %429 = vector.broadcast %428 : vector<2x1xf32> to vector<2x256xf32>
    %430 = arith.mulf %427, %429 : vector<2x256xf32>
    %431 = arith.addf %423, %430 : vector<2x256xf32>
    %c253_i32_217 = arith.constant 253 : i32
    %432 = tpu.dynamic_rotate %387 by %c253_i32_217 dim 1 : vector<2x256xf32>, i32 -> vector<2x256xf32>
    %c6_218 = arith.constant 6 : index
    %c0_219 = arith.constant 0 : index
    %433 = vector.load %arg7[%c6_218, %c0_219] : memref<7x256xf32, #tpu.memory_space<vmem>>, vector<1x256xf32>
    %434 = vector.broadcast %433 : vector<1x256xf32> to vector<2x256xf32>
    %435 = arith.mulf %432, %434 : vector<2x256xf32>
    %c0_220 = arith.constant 0 : index
    %c48 = arith.constant 48 : index
    %436 = vector.load %arg6[%c0_220, %c48] : memref<2x49xf32, #tpu.memory_space<vmem>>, vector<2x1xf32>
    %437 = vector.broadcast %436 : vector<2x1xf32> to vector<2x256xf32>
    %438 = arith.mulf %435, %437 : vector<2x256xf32>
    %439 = arith.addf %431, %438 : vector<2x256xf32>
    %cst_221 = arith.constant dense<0.000000e+00> : vector<256xf32>
    %440 = vector.multi_reduction <add>, %439, %cst_221 [0] : vector<2x256xf32> to vector<256xf32>
    %441 = vector.shape_cast %440 : vector<256xf32> to vector<1x256xf32>
    %c0_222 = arith.constant 0 : index
    %442 = memref.load %arg8[%c0_222] : memref<1xf32, #tpu.memory_space<smem>>
    %443 = vector.broadcast %442 : f32 to vector<1x256xf32>
    %444 = arith.addf %441, %443 : vector<1x256xf32>
    %445 = arith.negf %444 : vector<1x256xf32>
    %446 = math.exp %445 : vector<1x256xf32>
    %cst_223 = arith.constant 1.000000e+00 : f32
    %447 = vector.broadcast %cst_223 : f32 to vector<1x256xf32>
    %448 = arith.addf %447, %446 : vector<1x256xf32>
    %449 = arith.divf %447, %448 : vector<1x256xf32>
    %c0_224 = arith.constant 0 : index
    %c0_225 = arith.constant 0 : index
    %450 = vector.load %arg13[%c0_224, %c0_225] : memref<1x256xf32, #tpu.memory_space<vmem>>, vector<1x256xf32>
    tpu.vector_store %arg13[%c0_224, %c0_225], %449 {strides = array<i32>} : memref<1x256xf32, #tpu.memory_space<vmem>>, vector<1x256xf32>,
    %c0_i32_226 = arith.constant 0 : i32
    %c2_i32_227 = arith.constant 2 : i32
    %451 = arith.addi %c0_i32_226, %c2_i32_227 : i32
    %c1_i32_228 = arith.constant 1 : i32
    scf.for %arg14 = %c0_i32_226 to %451 step %c1_i32_228  : i32 {
      %c8_i32 = arith.constant 8 : i32
      %452 = arith.muli %arg14, %c8_i32 : i32
      %453 = tpu.assume_multiple %452, 8 : i32
      %c0_230 = arith.constant 0 : index
      %454 = arith.index_cast %453 : i32 to index
      %c0_231 = arith.constant 0 : index
      %455 = vector.load %arg1[%c0_230, %454, %c0_231] : memref<1x16x256xf32, #tpu.memory_space<vmem>>, vector<1x8x256xf32>
      %456 = vector.shape_cast %455 : vector<1x8x256xf32> to vector<8x256xf32>
      %457 = arith.index_cast %453 : i32 to index
      %c0_232 = arith.constant 0 : index
      %458 = vector.load %arg12[%457, %c0_232] : memref<16x1xf32, #tpu.memory_space<vmem>>, vector<8x1xf32>
      %459 = vector.broadcast %458 : vector<8x1xf32> to vector<8x256xf32>
      %460 = arith.mulf %456, %459 : vector<8x256xf32>
      %c0_233 = arith.constant 0 : index
      %c0_234 = arith.constant 0 : index
      %461 = vector.load %arg13[%c0_233, %c0_234] : memref<1x256xf32, #tpu.memory_space<vmem>>, vector<1x256xf32>
      %462 = vector.broadcast %461 : vector<1x256xf32> to vector<8x256xf32>
      %463 = arith.mulf %460, %462 : vector<8x256xf32>
      %c0_235 = arith.constant 0 : index
      %464 = arith.index_cast %453 : i32 to index
      %c0_236 = arith.constant 0 : index
      %465 = vector.load %arg9[%c0_235, %464, %c0_236] : memref<1x16x256xf32, #tpu.memory_space<vmem>>, vector<1x8x256xf32>
      %466 = vector.shape_cast %465 : vector<1x8x256xf32> to vector<8x256xf32>
      %467 = vector.shape_cast %463 : vector<8x256xf32> to vector<1x8x256xf32>
      tpu.vector_store %arg9[%c0_235, %464, %c0_236], %467 {strides = array<i32>} : memref<1x16x256xf32, #tpu.memory_space<vmem>>, vector<1x8x256xf32>,
    }
    %c2_i32_229 = arith.constant 2 : i32
    return
  }
  func.func @transform_0(%arg0: i32) -> (i32, i32, i32) {
    %c0_i32 = arith.constant 0 : i32
    %c0_i32_0 = arith.constant 0 : i32
    %c0_i32_1 = arith.constant 0 : i32
    return %arg0, %c0_i32, %c0_i32_0 : i32, i32, i32
  }
  func.func @transform_1(%arg0: i32) -> (i32, i32) {
    %c0_i32 = arith.constant 0 : i32
    %c0_i32_0 = arith.constant 0 : i32
    %c0_i32_1 = arith.constant 0 : i32
    return %c0_i32, %c0_i32_0 : i32, i32
  }
  func.func @transform_2(%arg0: i32) -> (i32, i32) {
    %c0_i32 = arith.constant 0 : i32
    %c0_i32_0 = arith.constant 0 : i32
    %c0_i32_1 = arith.constant 0 : i32
    return %c0_i32, %c0_i32_0 : i32, i32
  }
  func.func @transform_3(%arg0: i32) -> (i32, i32) {
    %c0_i32 = arith.constant 0 : i32
    %c0_i32_0 = arith.constant 0 : i32
    %c0_i32_1 = arith.constant 0 : i32
    return %c0_i32, %c0_i32_0 : i32, i32
  }
  func.func @transform_4(%arg0: i32) -> (i32, i32) {
    %c0_i32 = arith.constant 0 : i32
    %c0_i32_0 = arith.constant 0 : i32
    %c0_i32_1 = arith.constant 0 : i32
    return %c0_i32, %c0_i32_0 : i32, i32
  }
  func.func @transform_5(%arg0: i32) -> (i32, i32) {
    %c0_i32 = arith.constant 0 : i32
    %c0_i32_0 = arith.constant 0 : i32
    %c0_i32_1 = arith.constant 0 : i32
    return %c0_i32, %c0_i32_0 : i32, i32
  }
  func.func @transform_6(%arg0: i32) -> (i32, i32) {
    %c0_i32 = arith.constant 0 : i32
    %c0_i32_0 = arith.constant 0 : i32
    %c0_i32_1 = arith.constant 0 : i32
    return %c0_i32, %c0_i32_0 : i32, i32
  }
  func.func @transform_7(%arg0: i32) -> i32 {
    %c0_i32 = arith.constant 0 : i32
    %c0_i32_0 = arith.constant 0 : i32
    return %c0_i32 : i32
  }
  func.func @transform_8(%arg0: i32) -> (i32, i32, i32) {
    %c0_i32 = arith.constant 0 : i32
    %c0_i32_0 = arith.constant 0 : i32
    %c0_i32_1 = arith.constant 0 : i32
    return %arg0, %c0_i32, %c0_i32_0 : i32, i32, i32
  }
}

</mosaic_0001>

<bundles_post_ra>
// kernel: lesion_attention.1
= control target key start
LH: loop header
LB: loop body
LE: loop exit
PB: predicated region body
PF: predicated region fallthrough
CT: control target
= control target key end

     0   :  { %s2263_s29 = smov 0   ;;  %s3117_s0 = inlined_call_operand.vmem [shape: f32[2,16,256], index: 0, kind: input, shape index: {}]   ;;  %s3118_s1 = inlined_call_operand.vmem [shape: f32[2,16], index: 1, kind: input, shape index: {}]   ;;  %s3119_s2 = inlined_call_operand.vmem [shape: f32[2,1], index: 2, kind: input, shape index: {}]   ;;  %s3120_s3 = inlined_call_operand.vmem [shape: f32[16,2], index: 3, kind: input, shape index: {}]   ;;  %s3121_s4 = inlined_call_operand.vmem [shape: f32[16,1], index: 4, kind: input, shape index: {}]   ;;  %s3122_s5 = inlined_call_operand.vmem [shape: f32[2,49], index: 5, kind: input, shape index: {}]   ;;  %s3123_s6 = inlined_call_operand.vmem [shape: f32[7,256], index: 6, kind: input, shape index: {}]   ;;  %s3124_s7 = inlined_call_operand.<no memory space> [shape: f32[1], index: 7, kind: input, shape index: {}]   ;;  %s3125_s8 = inlined_call_operand.vmem [shape: f32[2,16,256], index: 8, kind: output, shape index: {}]  }
   0x1   :  { %13 = sst [smem:[#allocation6]] %s3124_s7 }
   0x2 LB: > { %s1807_s30 = sadd.s32 4294967295, %s2119_s29   ;;  %p1811_p0 = scmp.ge.s32.totalorder %s2119_s29, 1  ;;  %s2119_s29 = sphi %s2263_s29, %s19_s29  }
   0x3   : > { %p263_p1 = scmp.lt.s32.totalorder %s2119_s29, 3 }
   0x5   : > { %p264_p2 = pnand %p1811_p0, %p263_p1 }
   0x7   : > { %267 = sbr.rel (%p264_p2) target bundleno = 1784 (0x6f8), region = 52 }
   0xc   : > { %p297_p3 = scmp.lt.s32.totalorder %s1807_s30, 1  ;;  %s2121_s15 = smov 0  }
   0xe   : > { %s3138_s30 = smov (!%p297_p3, %s1807_s30), 1 }
   0xf   : > { %s1845_s9 = sshll.u32 %s3138_s30, 5 }
  0x10   : > { %s2274_s11 = scalar_lea.vmem %s3117_s0, %s1845_s9  ;;  %s2279_s14 = scalar_lea.vmem %s3125_s8, %s1845_s9 }
  0x11 LB: >> { %s1816_s16 = sshll.u32 %s2123_s15, 3  ;;  %vm327_vm0 = vcmask 7168   ;;  %s312_s15 = sadd.s32 1, %s2123_s15   ;;  %s2123_s15 = sphi %s2121_s15, %s312_s15  }
  0x12   : >> { %s314_s17 = sshra.s32 %s1816_s16, 3  ;;  %s326_s20 = scalar_lea.vmem [#allocation2], %s1816_s16 }
  0x13   : >> { %s1847_s18 = sshll.u32 %s314_s17, 4  ;;  %s332_s21 = scalar_lea.vmem [#allocation3], %s1816_s16 }
  0x14   : >> { %s318_s19 = scalar_lea.vmem %s2274_s11, %s1847_s18  ;;  %p309_p4 = scmp.ge.s32.totalorder %s312_s15, 2  }
  0x15   : >> { %v319_v0 = vld [vmem:[%s318_s19] sm:$0xff]  ;;  %v320_v1 = vld [vmem:[%s318_s19 + $0x8] sm:$0xff]  ;;  %v2149_v8 = vmov (%p309_p4), 0.0   ;;  %vm2150_vm1 = vmmov (%p309_p4), 0   ;;  %vm338_vm2 = vcmask (%p309_p4), 130048   ;;  %vm417_vm3 = vcmask (%p309_p4), 15360  }
  0x16   : >> { %v321_v2 = vadd.f32 %v320_v1, %v319_v0  ;;  %v329_v3 = vmax.f32 %v319_v0, %v320_v1  ;;  %1863 = vmatprep.subr.mxu0 (%p309_p4), %v2149_v8  ;;  %1867 = vmatprep.mubr.msk.f32.mxu0 (%p309_p4), %vm2150_vm1, %v2149_v8  ;;  %v336_v10 = vld [vmem:[%s3118_s1] sm:$0x3] (%p309_p4)  ;;  %vm424_vm4 = vcmask (%p309_p4), 1041408   ;;  %v414_v17 = vld [vmem:[%s3120_s3 + $0x8] sm:$0xff] (%p309_p4)  ;;  %v2125_v44 = vmov (%p309_p4), -inf   ;;  %s2316_s13 = smov (%p309_p4), 0  }
  0x17   : > { %v413_v11 = vld [vmem:[%s3120_s3] sm:$0xff] (%p309_p4)  ;;  %v416_v26 = vld [vmem:[%s3121_s4 + $0x8] sm:$0xff] (%p309_p4)  ;;  %v2129_v45 = vmov (%p309_p4), -inf   ;;  %v2133_v46 = vmov (%p309_p4), 0.0   ;;  %v2137_v47 = vmov (%p309_p4), 0.0  }
  0x18   : >> { %322 = vadd.xlane.f32.xlu0 %v321_v2  ;;  %1872 = vmatprep.mubr.msk.f32.mxu1 (%p309_p4), %vm417_vm3, %v413_v11  ;;  %v337_v12 = vld [vmem:[%s3119_s2] sm:$0x3] (%p309_p4) }
  0x19   : > { %v415_v27 = vld [vmem:[%s3121_s4] sm:$0xff] (%p309_p4) }
  0x1c   : >> { %330 = vmax.xlane.f32.xlu0 %v329_v3 }
  0xa1   : >> { %v323_v4 = vpop.xlane.xlu0 %322 }
  0xa2   : >> { %v325_v5 = vmul.f32 0.00390625, %v323_v4  ;;  %311 = sbr.rel (!%p309_p4) target bundleno = 17 (0x11), region = 116 }
  0xa4   : >> { %328 = vst.msk [vmem:[%s326_s20] sm:$0xff] %vm327_vm0, %v325_v5 }
  0xa5   : >> { %v331_v6 = vpop.xlane.xlu0 %330 }
  0xa6   : >> { %333 = vst.msk [vmem:[%s332_s21] sm:$0xff] %vm327_vm0, %v331_v6 }
  0xab   : > { %v335_v7 = vld [vmem:[#allocation2 + $0x8] sm:$0xff]  ;;  %v334_v9 = vld [vmem:[#allocation2] sm:$0xff] }
  0xac   : > { %1864 = vmatpush3.msra.mxu0 %v335_v7 }
  0xad   : > { %1865 = vmatprep.subr.mxu0 %v2149_v8  ;;  %v504_v18 = vld [vmem:[#allocation3 + $0x8] sm:$0xff]  ;;  %v503_v19 = vld [vmem:[#allocation3] sm:$0xff] }
  0xae   : > { %1866 = vmatpush3.msra.mxu0 %v334_v9 }
  0xaf   : > { %1868 = vmatmul.mubr.msk.f32.vlgmr.msra.gmra.mxu0 %vm338_vm2, %v336_v10 }
  0xb0   : > { %1884 = vmatprep.mubr.msk.f32.mxu0 %vm417_vm3, %v413_v11 }
 0x16f   : > { %v408_v13 = vpop.f32.mrf.mxu0 }
 0x170   : > { %v409_v14 = vadd.f32 %v408_v13, %v337_v12 }
 0x171   : > { %v1869_v15 = vpop.f32.mrf.mxu0 }
 0x172   : > { %v412_v16 = vmax.f32 %v409_v14, 0.0 }
 0x174   : > { %1870 = vmatprep.subr.msk.mxu1 %vm424_vm4, %v412_v16 }
 0x175   : > { %1871 = vmatpush3.msk.msra.mxu1 %vm424_vm4, %v412_v16 }
 0x176   : > { %1873 = vmatmul.mubr.msk.f32.vlgmr.msra.gmra.mxu1 %vm417_vm3, %v414_v17  ;;  %1875 = vmatprep.subr.mxu1 %v2149_v8 }
 0x177   : > { %1876 = vmatpush3.msra.mxu1 %v504_v18  ;;  %1879 = vmatprep.mubr.msk.f32.mxu1 %vm2150_vm1, %v2149_v8 }
 0x178   : > { %1877 = vmatprep.subr.mxu1 %v2149_v8 }
 0x179   : > { %1878 = vmatpush3.msra.mxu1 %v503_v19 }
 0x17a   : > { %1880 = vmatmul.mubr.msk.f32.vlgmr.msra.gmra.mxu1 %vm338_vm2, %v336_v10 }
 0x236   : > { %v1874_v20 = vpop.f32.mrf.mxu1 }
 0x237   : > { %v500_v29 = vadd.f32 %v1874_v20, %v416_v26 }
 0x238   : > { %v494_v21 = vpop.f32.mrf.mxu1 }
 0x239   : > { %v495_v32 = vadd.f32 %v494_v21, %v415_v27 }
 0x23a   : > { %v571_v22 = vpop.f32.mrf.mxu1 }
 0x23b   : > { %v572_v23 = vadd.f32 %v571_v22, %v337_v12 }
 0x23c   : > { %v1881_v24 = vpop.f32.mrf.mxu1 }
 0x23d   : > { %v575_v25 = vmax.f32 %v572_v23, 0.0 }
 0x23f   : > { %1882 = vmatprep.subr.msk.mxu0 %vm424_vm4, %v575_v25 }
 0x240   : > { %1883 = vmatpush3.msk.msra.mxu0 %vm424_vm4, %v575_v25 }
 0x241   : > { %1885 = vmatmul.mubr.msk.f32.vlgmr.msra.gmra.mxu0 %vm417_vm3, %v414_v17 }
 0x301   : > { %v1886_v28 = vpop.f32.mrf.mxu0 }
 0x302   : > { %v651_v30 = vadd.f32 %v1886_v28, %v416_v26 }
 0x303   : > { %v645_v31 = vpop.f32.mrf.mxu0 }
 0x304   : > { %v655_v33 = vadd.f32 %v651_v30, %v500_v29  ;;  %v646_v34 = vadd.f32 %v645_v31, %v415_v27 }
 0x306   : > { %v1828_v35 = vmul.f32 -1.442695, %v655_v33  ;;  %v654_v36 = vadd.f32 %v646_v34, %v495_v32 }
 0x308   : > { %2017 = vpow2.f32 %v1828_v35  ;;  %v1827_v37 = vmul.f32 -1.442695, %v654_v36 }
 0x30a   : > { %2019 = vpow2.f32 %v1827_v37 }
 0x315   : > { %v2018_v38 = vpop.eup %2017 }
 0x316   : > { %v663_v39 = vadd.f32 1.0, %v2018_v38 }
 0x317   : > { %v2020_v40 = vpop.eup %2019 }
 0x318   : > { %2021 = vrcp.f32 %v663_v39  ;;  %v662_v41 = vadd.f32 1.0, %v2020_v40 }
 0x31a   : > { %2023 = vrcp.f32 %v662_v41 }
 0x325   : > { %v2022_v42 = vpop.eup %2021 }
 0x326   : > { %670 = vst.msk [vmem:[#allocation4 + $0x8] sm:$0xff] %vm327_vm0, %v2022_v42 }
 0x327   : > { %v2024_v43 = vpop.eup %2023 }
 0x328   : > { %669 = vst.msk [vmem:[#allocation4] sm:$0xff] %vm327_vm0, %v2024_v43 }
 0x329 LB: >> { %v2151_v48 = vmov 0   ;;  %s1829_s15 = sshll.u32 %s2143_s13, 3  ;;  %s676_s13 = sadd.s32 1, %s2143_s13   ;;  %s2143_s13 = sphi %s2316_s13, %s676_s13   ;;  %v2139_v47 = vphi %v2137_v47, %v2138_v47   ;;  %v2135_v46 = vphi %v2133_v46, %v2134_v46   ;;  %v2131_v45 = vphi %v2129_v45, %v2130_v45   ;;  %v2127_v44 = vphi %v2125_v44, %v2126_v44  }
 0x32a   : >> { %2025 = vset.pattern.permute.xlu0 %v2151_v48  ;;  %s689_s16 = scalar_lea.vmem [#allocation4], %s1829_s15  ;;  %s682_s17 = sshra.s32 %s1829_s15, 3 }
 0x32b   : >> { %s1848_s18 = sshll.u32 %s682_s17, 4  ;;  %p673_p5 = scmp.ge.s32.totalorder %s676_s13, 2  }
 0x32c   : >> { %s686_s19 = scalar_lea.vmem %s2274_s11, %s1848_s18  ;;  %v2329_v17 = vld [vmem:[%s3122_s5] sm:$0x3] (%p673_p5)  ;;  %v3126_v18 = vlaneseq (%p673_p5)  ;;  %v2152_v19 = vmov (%p673_p5), 3   ;;  %v2153_v22 = vmov (%p673_p5), 0   ;;  %v2154_v25 = vmov (%p673_p5), 4   ;;  %s2155_s22 = smov (%p673_p5), 48  }
 0x32d   : >> { %v687_v50 = vld [vmem:[%s686_s19] sm:$0xff]  ;;  %v688_v51 = vld [vmem:[%s686_s19 + $0x8] sm:$0xff]  ;;  %2029 = vset.pattern.permute.xlu1 (%p673_p5), %v2152_v19  ;;  %s2156_s23 = smov (%p673_p5), 32   ;;  %v2157_v27 = vmov (%p673_p5), 10   ;;  %v2158_v28 = vmov (%p673_p5), 1   ;;  %v2159_v29 = vmov (%p673_p5), 11  }
 0x32e   : > { %839 = vperm.xlu1 (%p673_p5), %2029, %v2329_v17   ;;  %v2333_v21 = vshrl.u32 (%p673_p5), %v3126_v18, 7  ;;  %v2160_v30 = vmov (%p673_p5), 2   ;;  %s2161_s24 = smov (%p673_p5), 16   ;;  %v2162_v31 = vmov (%p673_p5), 5   ;;  %v2163_v32 = vmov (%p673_p5), 6   ;;  %s2172_s25 = smov (%p673_p5), 127  }
 0x32f   : >> { %v690_v49 = vld [vmem:[%s689_s16] sm:$0xff]  ;;  %v2164_v33 = vmov (%p673_p5), 7   ;;  %v2165_v34 = vmov (%p673_p5), 8   ;;  %v2166_v35 = vmov (%p673_p5), 9   ;;  %v2167_v36 = vmov (%p673_p5), 12   ;;  %s2173_s26 = smov (%p673_p5), 3  }
 0x330   : >> { %693 = vperm.xlu0 %2025, %v690_v49   ;;  %3130 = vst [vmem:[#allocation7_spill] sm:$0xff] (%p673_p5), %v2333_v21  ;;  %vm728_vm5 = vcmp.eq.s32.totalorder (%p673_p5), %v2333_v21, 0  ;;  %v2168_v37 = vmov (%p673_p5), 13   ;;  %v2169_v38 = vmov (%p673_p5), 14   ;;  %v2170_v39 = vmov (%p673_p5), 15   ;;  %s2174_s27 = smov (%p673_p5), 2  }
 0x331   : > { %v2171_v40 = vmov (%p673_p5), 17   ;;  %v2361_v41 = vand.u32 (%p673_p5), 127, %v3126_v18  ;;  %s2175_s28 = smov (%p673_p5), 1   ;;  %s2176_s30 = smov (%p673_p5), 126  }
 0x332   : > { %2030 = vset.pattern.permute.xlu1 (%p673_p5), %v2154_v25  ;;  %s2177_s9 = smov (%p673_p5), 125   ;;  %s2181_s10 = smov (%p673_p5), 112  }
 0x333   : > { %869 = vperm.xlu1 (%p673_p5), %2030, %v2329_v17   ;;  %vm740_vm6 = vcmp.lt.s32.totalorder (%p673_p5), %v2361_v41, 48  ;;  %vm940_vm7 = vcmp.lt.s32.totalorder (%p673_p5), %v2361_v41, 32  ;;  %vm743_vm8 = vcmp.ge.s32.totalorder (%p673_p5), %v2361_v41, 48  ;;  %vm943_vm9 = vcmp.ge.s32.totalorder (%p673_p5), %v2361_v41, 32  ;;  %s2183_s7 = smov (%p673_p5), 96   ;;  %s2192_s15 = smov (%p673_p5), 80  }
 0x334   : > { %2026 = vset.pattern.permute.xlu0 (%p673_p5), %v2153_v22  ;;  %vm1055_vm10 = vcmp.lt.s32.totalorder (%p673_p5), %v2361_v41, 16  ;;  %vm1058_vm11 = vcmp.ge.s32.totalorder (%p673_p5), %v2361_v41, 16  ;;  %vm751_vm12 = vcmp.lt.s32.totalorder (%p673_p5), %v2361_v41, 3  ;;  %vm782_vm13 = vcmp.lt.s32.totalorder (%p673_p5), %v2361_v41, 2 }
 0x335   : > { %vm880_vm14 = vcmp.lt.s32.totalorder (%p673_p5), %v2361_v41, 126  ;;  %vm812_vm15 = vcmp.lt.s32.totalorder (%p673_p5), %v2361_v41, 1  ;;  %vm850_vm0 = vcmp.lt.s32.totalorder (%p673_p5), %v2361_v41, 127  ;;  %vm910_vm1 = vcmp.lt.s32.totalorder (%p673_p5), %v2361_v41, 125 }
 0x336   : > { %vm1274_vm2 = vcmp.lt.s32.totalorder (%p673_p5), %v2361_v41, 112 }
 0x337   : > { %2036 = vset.pattern.permute.xlu1 (%p673_p5), %v2157_v27  ;;  %v2191_v27 = vmov (%p673_p5), 29  }
 0x3ab   : >> { %v694_v52 = vpop.permute.xlu0 %693 }
 0x3ac   : >> { %v696_v53 = vmul.f32 %v694_v52, %v687_v50  ;;  %v697_v54 = vmul.f32 %v694_v52, %v688_v51 }
 0x3ae   : >> { %v698_v55 = vrot.slane %v696_v53, 4  ;;  %v704_v56 = vrot.slane %v697_v54, 4 }
 0x3b0   : >> { %v699_v57 = vadd.f32 %v698_v55, %v696_v53  ;;  %v705_v58 = vadd.f32 %v704_v56, %v697_v54  ;;  %v713_v59 = vmax.f32 %v696_v53, %v698_v55  ;;  %v719_v60 = vmax.f32 %v697_v54, %v704_v56 }
 0x3b2   : >> { %v700_v61 = vrot.slane %v699_v57, 2  ;;  %v706_v62 = vrot.slane %v705_v58, 2  ;;  %v714_v63 = vrot.slane %v713_v59, 2  ;;  %v720_v0 = vrot.slane %v719_v60, 2 }
 0x3b4   : >> { %v701_v1 = vadd.f32 %v700_v61, %v699_v57  ;;  %v707_v2 = vadd.f32 %v706_v62, %v705_v58  ;;  %v715_v3 = vmax.f32 %v713_v59, %v714_v63  ;;  %v721_v4 = vmax.f32 %v719_v60, %v720_v0 }
 0x3b5   : > { %v2178_v61 = vmov (%p673_p5), 16   ;;  %v2179_v62 = vmov (%p673_p5), 19   ;;  %v2180_v63 = vmov (%p673_p5), 20  }
 0x3b6   : >> { %v702_v5 = vrot.slane %v701_v1, 1  ;;  %v708_v6 = vrot.slane %v707_v2, 1  ;;  %v716_v7 = vrot.slane %v715_v3, 1  ;;  %v722_v8 = vrot.slane %v721_v4, 1 }
 0x3b8   : >> { %v703_v9 = vadd.f32 %v702_v5, %v701_v1  ;;  %v709_v10 = vadd.f32 %v708_v6, %v707_v2  ;;  %v717_v11 = vmax.f32 %v715_v3, %v716_v7  ;;  %v723_v12 = vmax.f32 %v721_v4, %v722_v8  ;;  %675 = sbr.rel (!%p673_p5) target bundleno = 809 (0x329), region = 127 }
 0x3b9   : > { %v2182_v1 = vmov (%p673_p5), 21   ;;  %v2184_v3 = vmov (%p673_p5), 22   ;;  %v2185_v5 = vmov (%p673_p5), 23   ;;  %v2186_v7 = vmov (%p673_p5), 24  }
 0x3ba   : >> { %v710_v13 = vadd.f32 %v2139_v47, %v703_v9   ;;  %v711_v14 = vadd.f32 %v2135_v46, %v709_v10   ;;  %v724_v15 = vmax.f32 %v2131_v45, %v717_v11   ;;  %v725_v16 = vmax.f32 %v2127_v44, %v723_v12  }
 0x3bb   : > { %v2187_v9 = vmov (%p673_p5), 25   ;;  %v2188_v11 = vmov (%p673_p5), 26  }
 0x3bc   : >> { %v2126_v44 = vmov %v725_v16   ;;  %v2130_v45 = vmov %v724_v15   ;;  %v2134_v46 = vmov %v711_v14   ;;  %v2138_v47 = vmov %v710_v13  }
 0x3bd   : > { %v729_v20 = vmul.f32 0.0625, %v710_v13  ;;  %v730_v23 = vmul.f32 0.0625, %v711_v14  ;;  %v2368_v45 = vpop.permute.xlu1 %839  ;;  %v2189_v13 = vmov 18  }
 0x3bf   : > { %v2336_v24 = vsel %vm728_vm5, %v729_v20, %v724_v15  ;;  %v2340_v26 = vsel %vm728_vm5, %v730_v23, %v725_v16  ;;  %v2190_v15 = vmov 27   ;;  %vm1389_vm5 = vcmp.lt.s32.totalorder %v2361_v41, 96 }
 0x3c0   : > { %736 = vrot.lane.b32.xlu0 %v2336_v24, %s2155_s22  ;;  %936 = vrot.lane.b32.xlu1 %v2336_v24, %s2156_s23 }
 0x3c1   : > { %v2374_v46 = vpop.permute.xlu1 %869 }
 0x3c4   : > { %738 = vrot.lane.b32.xlu0 %v2340_v26, %s2155_s22  ;;  %938 = vrot.lane.b32.xlu1 %v2340_v26, %s2156_s23 }
 0x3c8   : > { %771 = vperm.xlu0 %2026, %v2329_v17   ;;  %996 = vperm.xlu1 %2036, %v2329_v17  }
 0x3cc   : > { %2027 = vset.pattern.permute.xlu0 %v2158_v28  ;;  %2037 = vset.pattern.permute.xlu1 %v2159_v29 }
 0x3cd   : > { %801 = vperm.xlu0 %2027, %v2329_v17   ;;  %1012 = vperm.xlu1 %2037, %v2329_v17  }
 0x3d1   : > { %2028 = vset.pattern.permute.xlu0 %v2160_v30  ;;  %1051 = vrot.lane.b32.xlu1 %v2336_v24, %s2161_s24 }
 0x3d2   : > { %831 = vperm.xlu0 %2028, %v2329_v17   ;;  %2043 = vset.pattern.permute.xlu1 %v2171_v40  ;;  %v754_v40 = vld [vmem:[%s3123_s6] ss:$8 sm:$0x3] }
 0x3d5   : > { %1053 = vrot.lane.b32.xlu1 %v2340_v26, %s2161_s24 }
 0x3d6   : > { %2031 = vset.pattern.permute.xlu0 %v2162_v31 }
 0x3d7   : > { %899 = vperm.xlu0 %2031, %v2329_v17  }
 0x3db   : > { %2032 = vset.pattern.permute.xlu0 %v2163_v32 }
 0x3dc   : > { %929 = vperm.xlu0 %2032, %v2329_v17  }
 0x3e0   : > { %2033 = vset.pattern.permute.xlu0 %v2164_v33 }
 0x3e1   : > { %956 = vperm.xlu0 %2033, %v2329_v17  }
 0x3e5   : > { %2034 = vset.pattern.permute.xlu0 %v2165_v34 }
 0x3e6   : > { %972 = vperm.xlu0 %2034, %v2329_v17  }
 0x3ea   : > { %2035 = vset.pattern.permute.xlu0 %v2166_v35 }
 0x3eb   : > { %988 = vperm.xlu0 %2035, %v2329_v17  }
 0x3ef   : > { %2038 = vset.pattern.permute.xlu0 %v2167_v36 }
 0x3f0   : > { %1028 = vperm.xlu0 %2038, %v2329_v17  }
 0x3f4   : > { %2039 = vset.pattern.permute.xlu0 %v2168_v37 }
 0x3f5   : > { %1044 = vperm.xlu0 %2039, %v2329_v17  }
 0x3f9   : > { %2040 = vset.pattern.permute.xlu0 %v2169_v38 }
 0x3fa   : > { %1071 = vperm.xlu0 %2040, %v2329_v17  }
 0x3fe   : > { %2041 = vset.pattern.permute.xlu0 %v2170_v39 }
 0x432   : > { %v737_v42 = vpop.permute.xlu0 %736  ;;  %v937_v47 = vpop.permute.xlu1 %936 }
 0x436   : > { %v739_v43 = vpop.permute.xlu0 %738  ;;  %v939_v48 = vpop.permute.xlu1 %938 }
 0x437   : > { %v2366_v44 = vsel %vm740_vm6, %v737_v42, %v739_v43  ;;  %v2383_v49 = vsel %vm940_vm7, %v937_v47, %v939_v48  ;;  %v742_v50 = vsel %vm740_vm6, %v739_v43, %v737_v42  ;;  %v942_v53 = vsel %vm940_vm7, %v939_v48, %v937_v47 }
 0x438   : > { %848 = vrot.lane.b32.xlu0 %v2366_v44, %s2172_s25  ;;  %749 = vrot.lane.b32.xlu1 %v2366_v44, %s2173_s26  ;;  %v2394_v52 = vsel %vm743_vm8, %v742_v50, 0.0  ;;  %v2401_v54 = vsel %vm943_vm9, %v942_v53, 0.0  ;;  %v2547_v42 = vsub.s32 0, %v2333_v21  ;;  %v2550_v43 = vsub.s32 1, %v2333_v21 }
 0x439   : > { %vm1504_vm7 = vcmp.lt.s32.totalorder %v2361_v41, 80 }
 0x43a   : > { %3132 = vst [vmem:[#allocation9_spill] sm:$0xff] %v2550_v43  ;;  %v2555_v47 = vrot.slane %v754_v40, %v2547_v42  ;;  %v2558_v48 = vrot.slane %v754_v40, %v2550_v43  ;;  %v843_v40 = vmul.f32 %v2368_v45, %v2366_v44 }
 0x43c   : > { %780 = vrot.lane.b32.xlu1 %v2366_v44, %s2174_s27  ;;  %1005 = vrot.lane.b32.xlu0 %v2383_v49, %s2172_s25 }
 0x440   : > { %810 = vrot.lane.b32.xlu1 %v2366_v44, %s2175_s28  ;;  %876 = vrot.lane.b32.xlu0 %v2394_v52, %s2176_s30 }
 0x443   : > { %v2390_v51 = vpop.permute.xlu1 %996  ;;  %v2445_v0 = vpop.permute.xlu0 %771 }
 0x444   : > { %878 = vrot.lane.b32.xlu1 %v2366_v44, %s2176_s30  ;;  %947 = vrot.lane.b32.xlu0 %v2401_v54, %s2173_s26 }
 0x448   : > { %908 = vrot.lane.b32.xlu1 %v2366_v44, %s2177_s9  ;;  %v2403_v55 = vpop.permute.xlu1 %1012  ;;  %1019 = vrot.lane.b32.xlu0 %v2401_v54, %s2176_s30  ;;  %v2454_v2 = vpop.permute.xlu0 %801 }
 0x44c   : > { %949 = vrot.lane.b32.xlu1 %v2383_v49, %s2173_s26  ;;  %v1052_v56 = vpop.permute.xlu1 %1051 }
 0x44d   : > { %v2460_v4 = vpop.permute.xlu0 %831 }
 0x450   : > { %965 = vrot.lane.b32.xlu1 %v2383_v49, %s2174_s27  ;;  %v1054_v57 = vpop.permute.xlu1 %1053 }
 0x451   : > { %v1057_v58 = vsel %vm1055_vm10, %v1054_v57, %v1052_v56  ;;  %v2424_v60 = vsel %vm1055_vm10, %v1052_v56, %v1054_v57 }
 0x452   : > { %v2415_v59 = vsel %vm1058_vm11, %v1057_v58, 0.0  ;;  %3131 = vst [vmem:[#allocation8_spill] sm:$0xff] %v2424_v60  ;;  %v2468_v6 = vpop.permute.xlu0 %899 }
 0x453   : > { %1062 = vrot.lane.b32.xlu0 %v2415_v59, %s2173_s26 }
 0x454   : > { %981 = vrot.lane.b32.xlu1 %v2383_v49, %s2175_s28 }
 0x457   : > { %1087 = vperm.xlu0 %2041, %v2329_v17   ;;  %v2473_v8 = vpop.permute.xlu0 %929 }
 0x458   : > { %1021 = vrot.lane.b32.xlu1 %v2383_v49, %s2176_s30 }
 0x45b   : > { %2042 = vset.pattern.permute.xlu0 %v2178_v61 }
 0x45c   : > { %1037 = vrot.lane.b32.xlu1 %v2383_v49, %s2177_s9  ;;  %1103 = vperm.xlu0 %2042, %v2329_v17   ;;  %v2478_v10 = vpop.permute.xlu0 %956 }
 0x460   : > { %1064 = vrot.lane.b32.xlu1 %v2424_v60, %s2173_s26  ;;  %1120 = vrot.lane.b32.xlu0 %v2424_v60, %s2172_s25 }
 0x461   : > { %2045 = vset.pattern.permute.xlu0 %v2179_v62  ;;  %v2484_v12 = vpop.permute.xlu0 %972 }
 0x464   : > { %1080 = vrot.lane.b32.xlu1 %v2424_v60, %s2174_s27  ;;  %1134 = vrot.lane.b32.xlu0 %v2415_v59, %s2176_s30 }
 0x466   : > { %v2490_v14 = vpop.permute.xlu0 %988 }
 0x468   : > { %747 = vrot.lane.b32.xlu1 %v2394_v52, %s2173_s26  ;;  %1143 = vperm.xlu0 %2045, %v2329_v17  }
 0x46b   : > { %v2495_v16 = vpop.permute.xlu0 %1028 }
 0x46c   : > { %778 = vrot.lane.b32.xlu1 %v2394_v52, %s2174_s27  ;;  %2046 = vset.pattern.permute.xlu0 %v2180_v63 }
 0x46d   : > { %1159 = vperm.xlu0 %2046, %v2329_v17  }
 0x470   : > { %808 = vrot.lane.b32.xlu1 %v2394_v52, %s2175_s28  ;;  %v2499_v20 = vpop.permute.xlu0 %1044 }
 0x471   : > { %1272 = vrot.lane.b32.xlu0 %v2340_v26, %s2181_s10 }
 0x472   : > { %2047 = vset.pattern.permute.xlu0 %v2182_v1 }
 0x474   : > { %846 = vrot.lane.b32.xlu1 %v2394_v52, %s2172_s25 }
 0x475   : > { %1175 = vperm.xlu0 %2047, %v2329_v17   ;;  %v1072_v23 = vpop.permute.xlu0 %1071 }
 0x478   : > { %906 = vrot.lane.b32.xlu1 %v2394_v52, %s2177_s9 }
 0x479   : > { %1385 = vrot.lane.b32.xlu0 %v2336_v24, %s2183_s7 }
 0x47a   : > { %2048 = vset.pattern.permute.xlu0 %v2184_v3  ;;  %v1832_v3 = vld [vmem:[%s3123_s6 + $0x1] ss:$8 sm:$0x3] }
 0x47c   : > { %963 = vrot.lane.b32.xlu1 %v2401_v54, %s2174_s27 }
 0x47d   : > { %1191 = vperm.xlu0 %2048, %v2329_v17  }
 0x480   : > { %979 = vrot.lane.b32.xlu1 %v2401_v54, %s2175_s28 }
 0x481   : > { %2049 = vset.pattern.permute.xlu0 %v2185_v5 }
 0x482   : > { %1207 = vperm.xlu0 %2049, %v2329_v17  }
 0x484   : > { %1003 = vrot.lane.b32.xlu1 %v2401_v54, %s2172_s25 }
 0x486   : > { %2050 = vset.pattern.permute.xlu0 %v2186_v7  ;;  %v2582_v7 = vrot.slane %v1832_v3, %v2547_v42 }
 0x487   : > { %1215 = vperm.xlu0 %2050, %v2329_v17  }
 0x488   : > { %1035 = vrot.lane.b32.xlu1 %v2401_v54, %s2177_s9 }
 0x48b   : > { %2051 = vset.pattern.permute.xlu0 %v2187_v9  ;;  %v2585_v9 = vrot.slane %v1832_v3, %v2550_v43 }
 0x48c   : > { %1078 = vrot.lane.b32.xlu1 %v2415_v59, %s2174_s27  ;;  %1231 = vperm.xlu0 %2051, %v2329_v17  }
 0x490   : > { %1094 = vrot.lane.b32.xlu1 %v2415_v59, %s2175_s28  ;;  %2052 = vset.pattern.permute.xlu0 %v2188_v11  ;;  %v1833_v11 = vld [vmem:[%s3123_s6 + $0x2] ss:$8 sm:$0x3] }
 0x491   : > { %1247 = vperm.xlu0 %2052, %v2329_v17   ;;  %v2614_v44 = vrot.slane %v1833_v11, %v2550_v43 }
 0x494   : > { %1096 = vrot.lane.b32.xlu1 %v2424_v60, %s2175_s28 }
 0x495   : > { %1256 = vrot.lane.b32.xlu0 %v2340_v26, %s2177_s9 }
 0x496   : > { %2055 = vset.pattern.permute.xlu0 %v2191_v27  ;;  %v842_v27 = vmul.f32 %v2368_v45, %v2394_v52  ;;  %v2611_v52 = vrot.slane %v1833_v11, %v2547_v42 }
 0x498   : > { %1111 = vperm.xlu1 %2043, %v2329_v17  }
 0x49c   : > { %1118 = vrot.lane.b32.xlu1 %v2415_v59, %s2172_s25 }
 0x49d   : > { %2044 = vset.pattern.permute.xlu1 %v2189_v13  ;;  %v1835_v13 = vld [vmem:[%s3123_s6 + $0x5] ss:$8 sm:$0x3] }
 0x49e   : > { %v2623_v3 = vrot.slane %v1835_v13, %v2547_v42 }
 0x4a0   : > { %1127 = vperm.xlu1 %2044, %v2329_v17  }
 0x4a4   : > { %1136 = vrot.lane.b32.xlu1 %v2424_v60, %s2176_s30 }
 0x4a5   : > { %2053 = vset.pattern.permute.xlu1 %v2190_v15 }
 0x4a8   : > { %1150 = vrot.lane.b32.xlu1 %v2415_v59, %s2177_s9 }
 0x4aa   : > { %v750_v19 = vpop.permute.xlu1 %749  ;;  %v2511_v29 = vpop.permute.xlu0 %848 }
 0x4ac   : > { %1152 = vrot.lane.b32.xlu1 %v2424_v60, %s2177_s9 }
 0x4ae   : > { %v781_v22 = vpop.permute.xlu1 %780  ;;  %v2517_v31 = vpop.permute.xlu0 %1005 }
 0x4b0   : > { %1166 = vrot.lane.b32.xlu1 %v2336_v24, %s2173_s26 }
 0x4b2   : > { %v2505_v25 = vpop.permute.xlu1 %810  ;;  %v877_v33 = vpop.permute.xlu0 %876 }
 0x4b4   : > { %1270 = vrot.lane.b32.xlu1 %v2336_v24, %s2181_s10 }
 0x4b6   : > { %v2509_v28 = vpop.permute.xlu1 %878  ;;  %v2531_v36 = vpop.permute.xlu0 %947 }
 0x4b7   : > { %v881_v11 = vsel %vm880_vm14, %v877_v33, %v2509_v28 }
 0x4b8   : > { %1168 = vrot.lane.b32.xlu1 %v2340_v26, %s2173_s26 }
 0x4ba   : > { %v2515_v30 = vpop.permute.xlu1 %908  ;;  %v2539_v38 = vpop.permute.xlu0 %1019 }
 0x4bc   : > { %1182 = vrot.lane.b32.xlu1 %v2336_v24, %s2174_s27 }
 0x4be   : > { %v2521_v32 = vpop.permute.xlu1 %949 }
 0x4c0   : > { %1184 = vrot.lane.b32.xlu1 %v2340_v26, %s2174_s27 }
 0x4c2   : > { %v2525_v34 = vpop.permute.xlu1 %965 }
 0x4c4   : > { %1387 = vrot.lane.b32.xlu1 %v2340_v26, %s2183_s7 }
 0x4c5   : > { %v1063_v50 = vpop.permute.xlu0 %1062 }
 0x4c6   : > { %v2529_v35 = vpop.permute.xlu1 %981 }
 0x4c8   : > { %1198 = vrot.lane.b32.xlu1 %v2336_v24, %s2175_s28 }
 0x4ca   : > { %v2535_v37 = vpop.permute.xlu1 %1021 }
 0x4cc   : > { %1200 = vrot.lane.b32.xlu1 %v2340_v26, %s2175_s28 }
 0x4ce   : > { %v2541_v39 = vpop.permute.xlu1 %1037 }
 0x4d0   : > { %1500 = vrot.lane.b32.xlu1 %v2336_v24, %s2192_s15 }
 0x4d2   : > { %v1065_v53 = vpop.permute.xlu1 %1064 }
 0x4d3   : > { %v1066_v56 = vsel %vm751_vm12, %v1063_v50, %v1065_v53  ;;  %v1067_v57 = vsel %vm751_vm12, %v1065_v53, %v1063_v50  ;;  %v1834_v53 = vld [vmem:[%s3123_s6 + $0x4] ss:$8 sm:$0x3] }
 0x4d4   : > { %v1068_v58 = vmul.f32 %v1067_v57, %v2555_v47  ;;  %v1069_v61 = vmul.f32 %v1066_v56, %v2558_v48  ;;  %1502 = vrot.lane.b32.xlu1 %v2340_v26, %s2192_s15  ;;  %v2650_v21 = vrot.slane %v1834_v53, %v2550_v43 }
 0x4d6   : > { %v2567_v62 = vmul.f32 %v1072_v23, %v1068_v58  ;;  %v2569_v63 = vmul.f32 %v1072_v23, %v1069_v61  ;;  %v2571_v1 = vpop.permute.xlu1 %1080 }
 0x4d8   : > { %1222 = vrot.lane.b32.xlu1 %v2336_v24, %s2172_s25 }
 0x4da   : > { %v748_v5 = vpop.permute.xlu1 %747 }
 0x4db   : > { %v752_v15 = vsel %vm751_vm12, %v748_v5, %v750_v19  ;;  %v753_v23 = vsel %vm751_vm12, %v750_v19, %v748_v5  ;;  %v2630_v5 = vrot.slane %v1834_v53, %v2547_v42 }
 0x4dc   : > { %1224 = vrot.lane.b32.xlu1 %v2340_v26, %s2172_s25  ;;  %v766_v45 = vmul.f32 %v2555_v47, %v753_v23  ;;  %v767_v57 = vmul.f32 %v2558_v48, %v752_v15  ;;  %v882_v15 = vsel %vm880_vm14, %v2509_v28, %v877_v33 }
 0x4de   : > { %v779_v50 = vpop.permute.xlu1 %778  ;;  %v775_v28 = vmul.f32 %v2445_v0, %v767_v57 }
 0x4df   : > { %v783_v56 = vsel %vm782_vm13, %v779_v50, %v781_v22  ;;  %v784_v19 = vsel %vm782_vm13, %v781_v22, %v779_v50  ;;  %v2626_v22 = vrot.slane %v1835_v13, %v2550_v43  ;;  %v1836_v13 = vld [vmem:[%s3123_s6 + $0x6] ss:$8 sm:$0x3] }
 0x4e0   : > { %v798_v58 = vmul.f32 %v2582_v7, %v784_v19  ;;  %v799_v61 = vmul.f32 %v2585_v9, %v783_v56  ;;  %1238 = vrot.lane.b32.xlu1 %v2336_v24, %s2176_s30  ;;  %v2662_v53 = vrot.slane %v1836_v13, %v2547_v42 }
 0x4e2   : > { %v804_v23 = vmul.f32 %v2454_v2, %v798_v58  ;;  %v805_v50 = vmul.f32 %v2454_v2, %v799_v61  ;;  %v809_v56 = vpop.permute.xlu1 %808  ;;  %v774_v2 = vmul.f32 %v2445_v0, %v766_v45  ;;  %v896_v61 = vmul.f32 %v2623_v3, %v881_v11 }
 0x4e3   : > { %v813_v19 = vsel %vm812_vm15, %v809_v56, %v2505_v25  ;;  %v814_v18 = vsel %vm812_vm15, %v2505_v25, %v809_v56  ;;  %v897_v25 = vmul.f32 %v2626_v22, %v882_v15  ;;  %v2665_v56 = vrot.slane %v1836_v13, %v2550_v43 }
 0x4e4   : > { %v828_v33 = vmul.f32 %v2611_v52, %v814_v18  ;;  %v829_v58 = vmul.f32 %v2614_v44, %v813_v19  ;;  %1240 = vrot.lane.b32.xlu1 %v2340_v26, %s2176_s30  ;;  %v806_v45 = vadd.f32 %v804_v23, %v774_v2  ;;  %v807_v60 = vadd.f32 %v805_v50, %v775_v28 }
 0x4e5   : > { %v951_v11 = vsel %vm751_vm12, %v2531_v36, %v2521_v32  ;;  %v952_v15 = vsel %vm751_vm12, %v2521_v32, %v2531_v36  ;;  %v902_v28 = vmul.f32 %v2468_v6, %v896_v61  ;;  %v903_v32 = vmul.f32 %v2468_v6, %v897_v25 }
 0x4e6   : > { %v834_v0 = vmul.f32 %v2460_v4, %v828_v33  ;;  %v835_v18 = vmul.f32 %v2460_v4, %v829_v58  ;;  %v847_v57 = vpop.permute.xlu1 %846 }
 0x4e7   : > { %v851_v23 = vsel %vm850_vm0, %v847_v57, %v2511_v29  ;;  %v852_v50 = vsel %vm850_vm0, %v2511_v29, %v847_v57 }
 0x4e8   : > { %v836_v4 = vadd.f32 %v834_v0, %v806_v45  ;;  %v837_v13 = vadd.f32 %v835_v18, %v807_v60  ;;  %v866_v19 = vmul.f32 %v2630_v5, %v851_v23  ;;  %v867_v2 = vmul.f32 %v2650_v21, %v852_v50  ;;  %1254 = vrot.lane.b32.xlu1 %v2336_v24, %s2177_s9 }
 0x4e9   : > { %v953_v60 = vmul.f32 %v952_v15, %v2555_v47  ;;  %v954_v45 = vmul.f32 %v951_v11, %v2558_v48 }
 0x4ea   : > { %v844_v36 = vadd.f32 %v842_v27, %v836_v4  ;;  %v845_v33 = vadd.f32 %v843_v40, %v837_v13  ;;  %v872_v58 = vmul.f32 %v2374_v46, %v866_v19  ;;  %v873_v43 = vmul.f32 %v2374_v46, %v867_v2  ;;  %v907_v29 = vpop.permute.xlu1 %906 }
 0x4eb   : > { %v911_v0 = vsel %vm910_vm1, %v907_v29, %v2515_v30  ;;  %v912_v61 = vsel %vm910_vm1, %v2515_v30, %v907_v29  ;;  %v959_v23 = vmul.f32 %v2478_v10, %v953_v60  ;;  %v960_v50 = vmul.f32 %v2478_v10, %v954_v45 }
 0x4ec   : > { %v874_v6 = vadd.f32 %v872_v58, %v844_v36  ;;  %v875_v27 = vadd.f32 %v873_v43, %v845_v33  ;;  %v926_v40 = vmul.f32 %v2662_v53, %v911_v0  ;;  %v927_v25 = vmul.f32 %v2665_v56, %v912_v61  ;;  %1263 = vperm.xlu1 %2053, %v2329_v17  }
 0x4ed   : > { %v1023_v29 = vsel %vm880_vm14, %v2539_v38, %v2535_v37  ;;  %v1024_v60 = vsel %vm880_vm14, %v2535_v37, %v2539_v38  ;;  %v999_v0 = vmul.f32 %v2390_v51, %v2401_v54  ;;  %v2194_v61 = vmov 32  }
 0x4ee   : > { %v904_v46 = vadd.f32 %v902_v28, %v874_v6  ;;  %v905_v18 = vadd.f32 %v903_v32, %v875_v27  ;;  %v932_v57 = vmul.f32 %v2473_v8, %v926_v40  ;;  %v933_v11 = vmul.f32 %v2473_v8, %v927_v25  ;;  %v964_v15 = vpop.permute.xlu1 %963 }
 0x4ef   : > { %v967_v30 = vsel %vm782_vm13, %v964_v15, %v2525_v34  ;;  %v968_v43 = vsel %vm782_vm13, %v2525_v34, %v964_v15  ;;  %v2193_v8 = vmov 28   ;;  %v1025_v37 = vmul.f32 %v1023_v29, %v2623_v3 }
 0x4f0   : > { %v934_v4 = vadd.f32 %v932_v57, %v904_v46  ;;  %v935_v13 = vadd.f32 %v933_v11, %v905_v18  ;;  %v969_v19 = vmul.f32 %v968_v43, %v2582_v7  ;;  %v970_v2 = vmul.f32 %v967_v30, %v2585_v9  ;;  %2054 = vset.pattern.permute.xlu1 %v2193_v8 }
 0x4f1   : > { %1290 = vperm.xlu1 %2054, %v2329_v17   ;;  %v1026_v38 = vmul.f32 %v1024_v60, %v2626_v22  ;;  %v1031_v43 = vmul.f32 %v2495_v16, %v1025_v37 }
 0x4f2   : > { %v961_v28 = vadd.f32 %v959_v23, %v934_v4  ;;  %v962_v10 = vadd.f32 %v960_v50, %v935_v13  ;;  %v975_v32 = vmul.f32 %v2484_v12, %v969_v19  ;;  %v976_v36 = vmul.f32 %v2484_v12, %v970_v2  ;;  %v980_v33 = vpop.permute.xlu1 %979 }
 0x4f3   : > { %v983_v34 = vsel %vm812_vm15, %v980_v33, %v2529_v35  ;;  %v984_v58 = vsel %vm812_vm15, %v2529_v35, %v980_v33  ;;  %v1000_v35 = vmul.f32 %v2390_v51, %v2383_v49  ;;  %v1032_v4 = vmul.f32 %v2495_v16, %v1026_v38 }
 0x4f4   : > { %v985_v12 = vmul.f32 %v984_v58, %v2611_v52  ;;  %v986_v45 = vmul.f32 %v983_v34, %v2614_v44  ;;  %v977_v6 = vadd.f32 %v975_v32, %v961_v28  ;;  %v978_v27 = vadd.f32 %v976_v36, %v962_v10 }
 0x4f5   : > { %2058 = vset.pattern.permute.xlu1 %v2194_v61 }
 0x4f6   : > { %v991_v40 = vmul.f32 %v2490_v14, %v985_v12  ;;  %v992_v25 = vmul.f32 %v2490_v14, %v986_v45  ;;  %v1004_v46 = vpop.permute.xlu1 %1003  ;;  %v1088_v12 = vpop.permute.xlu0 %1087 }
 0x4f7   : > { %v1007_v54 = vsel %vm850_vm0, %v1004_v46, %v2517_v31  ;;  %v1008_v49 = vsel %vm850_vm0, %v2517_v31, %v1004_v46 }
 0x4f8   : > { %v993_v51 = vadd.f32 %v991_v40, %v977_v6  ;;  %v994_v18 = vadd.f32 %v992_v25, %v978_v27  ;;  %v1009_v57 = vmul.f32 %v1007_v54, %v2630_v5  ;;  %v1010_v11 = vmul.f32 %v1008_v49, %v2650_v21 }
 0x4fa   : > { %v1001_v14 = vadd.f32 %v999_v0, %v993_v51  ;;  %v1002_v15 = vadd.f32 %v1000_v35, %v994_v18  ;;  %v1015_v23 = vmul.f32 %v2403_v55, %v1009_v57  ;;  %v1016_v50 = vmul.f32 %v2403_v55, %v1010_v11  ;;  %v1036_v30 = vpop.permute.xlu1 %1035  ;;  %v1104_v38 = vpop.permute.xlu0 %1103 }
 0x4fb   : > { %v1039_v31 = vsel %vm910_vm1, %v1036_v30, %v2541_v39  ;;  %v1040_v13 = vsel %vm910_vm1, %v2541_v39, %v1036_v30 }
 0x4fc   : > { %v1017_v19 = vadd.f32 %v1015_v23, %v1001_v14  ;;  %v1018_v2 = vadd.f32 %v1016_v50, %v1002_v15  ;;  %v1041_v8 = vmul.f32 %v1039_v31, %v2662_v53  ;;  %v1042_v28 = vmul.f32 %v1040_v13, %v2665_v56  ;;  %v3133_v14 = vld [vmem:[#allocation8_spill] sm:$0xff] }
 0x4fe   : > { %v1033_v55 = vadd.f32 %v1031_v43, %v1017_v19  ;;  %v1034_v10 = vadd.f32 %v1032_v4, %v1018_v2  ;;  %v1047_v32 = vmul.f32 %v2499_v20, %v1041_v8  ;;  %v1048_v16 = vmul.f32 %v2499_v20, %v1042_v28  ;;  %v1079_v36 = vpop.permute.xlu1 %1078  ;;  %v1121_v18 = vpop.permute.xlu0 %1120 }
 0x4ff   : > { %v1082_v33 = vsel %vm782_vm13, %v1079_v36, %v2571_v1  ;;  %v1083_v39 = vsel %vm782_vm13, %v2571_v1, %v1079_v36 }
 0x500   : > { %v1049_v34 = vadd.f32 %v1047_v32, %v1033_v55  ;;  %v1050_v58 = vadd.f32 %v1048_v16, %v1034_v10  ;;  %v1084_v29 = vmul.f32 %v1083_v39, %v2582_v7  ;;  %v1085_v60 = vmul.f32 %v1082_v33, %v2585_v9 }
 0x502   : > { %v1076_v45 = vadd.f32 %v2567_v62, %v1049_v34  ;;  %v1077_v20 = vadd.f32 %v2569_v63, %v1050_v58  ;;  %v1090_v0 = vmul.f32 %v1088_v12, %v1084_v29  ;;  %v1091_v35 = vmul.f32 %v1088_v12, %v1085_v60  ;;  %v1095_v61 = vpop.permute.xlu1 %1094  ;;  %v1135_v31 = vpop.permute.xlu0 %1134 }
 0x504   : > { %v1092_v6 = vadd.f32 %v1090_v0, %v1076_v45  ;;  %v1093_v27 = vadd.f32 %v1091_v35, %v1077_v20 }
 0x506   : > { %v1097_v40 = vpop.permute.xlu1 %1096  ;;  %v1144_v16 = vpop.permute.xlu0 %1143 }
 0x507   : > { %v1098_v1 = vsel %vm812_vm15, %v1095_v61, %v1097_v40  ;;  %v1099_v25 = vsel %vm812_vm15, %v1097_v40, %v1095_v61 }
 0x508   : > { %v1100_v46 = vmul.f32 %v1099_v25, %v2611_v52  ;;  %v1101_v37 = vmul.f32 %v1098_v1, %v2614_v44 }
 0x50a   : > { %v1106_v62 = vmul.f32 %v1104_v38, %v1100_v46  ;;  %v1107_v54 = vmul.f32 %v1104_v38, %v1101_v37  ;;  %v1160_v12 = vpop.permute.xlu0 %1159 }
 0x50c   : > { %v1108_v63 = vadd.f32 %v1106_v62, %v1092_v6  ;;  %v1109_v49 = vadd.f32 %v1107_v54, %v1093_v27  ;;  %v2800_v6 = vadd.s32 128, %v2361_v41 }
 0x50e   : > { %v1273_v25 = vpop.permute.xlu0 %1272  ;;  %vm1278_vm3 = vcmp.lt.s32.totalorder %v2800_v6, 240  ;;  %vm1393_vm6 = vcmp.lt.s32.totalorder %v2800_v6, 224  ;;  %vm1508_vm8 = vcmp.lt.s32.totalorder %v2800_v6, 208  ;;  %v2210_v6 = vmov 46  }
 0x513   : > { %v1112_v51 = vpop.permute.xlu1 %1111 }
 0x514   : > { %v1114_v11 = vmul.f32 %v1112_v51, %v2415_v59  ;;  %v1115_v15 = vmul.f32 %v1112_v51, %v3133_v14 }
 0x516   : > { %v1116_v13 = vadd.f32 %v1114_v11, %v1108_v63  ;;  %v1117_v19 = vadd.f32 %v1115_v15, %v1109_v49  ;;  %v1176_v63 = vpop.permute.xlu0 %1175 }
 0x517   : > { %v1119_v57 = vpop.permute.xlu1 %1118 }
 0x518   : > { %v1122_v23 = vsel %vm850_vm0, %v1119_v57, %v1121_v18  ;;  %v1123_v50 = vsel %vm850_vm0, %v1121_v18, %v1119_v57 }
 0x519   : > { %v1124_v30 = vmul.f32 %v1122_v23, %v2630_v5  ;;  %v1125_v43 = vmul.f32 %v1123_v50, %v2650_v21 }
 0x51a   : > { %v2821_v15 = vpop.permute.xlu0 %1385 }
 0x51b   : > { %v1128_v4 = vpop.permute.xlu1 %1127 }
 0x51c   : > { %v1130_v2 = vmul.f32 %v1128_v4, %v1124_v30  ;;  %v1131_v8 = vmul.f32 %v1128_v4, %v1125_v43 }
 0x51e   : > { %v1132_v28 = vadd.f32 %v1130_v2, %v1116_v13  ;;  %v1133_v59 = vadd.f32 %v1131_v8, %v1117_v19  ;;  %v1192_v8 = vpop.permute.xlu0 %1191 }
 0x51f   : > { %v1137_v55 = vpop.permute.xlu1 %1136 }
 0x520   : > { %v1138_v10 = vsel %vm880_vm14, %v1135_v31, %v1137_v55  ;;  %v1139_v32 = vsel %vm880_vm14, %v1137_v55, %v1135_v31  ;;  %v2195_v31 = vmov 30   ;;  %v2196_v55 = vmov 31  }
 0x521   : > { %v1140_v36 = vmul.f32 %v1138_v10, %v2623_v3  ;;  %v1141_v33 = vmul.f32 %v1139_v32, %v2626_v22 }
 0x523   : > { %v1146_v39 = vmul.f32 %v1144_v16, %v1140_v36  ;;  %v1147_v34 = vmul.f32 %v1144_v16, %v1141_v33  ;;  %v1151_v58 = vpop.permute.xlu1 %1150 }
 0x525   : > { %v1148_v29 = vadd.f32 %v1146_v39, %v1132_v28  ;;  %v1149_v60 = vadd.f32 %v1147_v34, %v1133_v59  ;;  %v2197_v34 = vmov 34  }
 0x527   : > { %v1153_v45 = vpop.permute.xlu1 %1152 }
 0x528   : > { %v1154_v20 = vsel %vm910_vm1, %v1151_v58, %v1153_v45  ;;  %v1155_v0 = vsel %vm910_vm1, %v1153_v45, %v1151_v58 }
 0x529   : > { %v1156_v35 = vmul.f32 %v1154_v20, %v2662_v53  ;;  %v1157_v61 = vmul.f32 %v1155_v0, %v2665_v56  ;;  %v1208_v20 = vpop.permute.xlu0 %1207 }
 0x52b   : > { %v1162_v27 = vmul.f32 %v1160_v12, %v1156_v35  ;;  %v1163_v40 = vmul.f32 %v1160_v12, %v1157_v61  ;;  %v1167_v1 = vpop.permute.xlu1 %1166 }
 0x52d   : > { %v1164_v46 = vadd.f32 %v1162_v27, %v1148_v29  ;;  %v1165_v37 = vadd.f32 %v1163_v40, %v1149_v60  ;;  %v2198_v27 = vmov 33  }
 0x52f   : > { %v1271_v38 = vpop.permute.xlu1 %1270 }
 0x530   : > { %v2804_v62 = vsel %vm1274_vm2, %v1271_v38, %v1273_v25  ;;  %v1276_v54 = vsel %vm1274_vm2, %v1273_v25, %v1271_v38 }
 0x531   : > { %v2806_v49 = vsel %vm1278_vm3, %v1276_v54, 0.0  ;;  %1281 = vrot.lane.b32.xlu0 %v2804_v62, %s2173_s26  ;;  %v2200_v54 = vmov 39  }
 0x532   : > { %1283 = vrot.lane.b32.xlu1 %v2806_v49, %s2173_s26 }
 0x533   : > { %v1169_v51 = vpop.permute.xlu1 %1168 }
 0x534   : > { %v1170_v18 = vsel %vm751_vm12, %v1167_v1, %v1169_v51  ;;  %v1171_v57 = vsel %vm751_vm12, %v1169_v51, %v1167_v1 }
 0x535   : > { %1306 = vperm.xlu0 %2055, %v2329_v17   ;;  %v1172_v11 = vmul.f32 %v1171_v57, %v2555_v47  ;;  %v1173_v14 = vmul.f32 %v1170_v18, %v2558_v48 }
 0x536   : > { %1297 = vrot.lane.b32.xlu1 %v2804_v62, %s2174_s27 }
 0x537   : > { %v1178_v23 = vmul.f32 %v1176_v63, %v1172_v11  ;;  %v1179_v50 = vmul.f32 %v1176_v63, %v1173_v14  ;;  %v1183_v30 = vpop.permute.xlu1 %1182  ;;  %v2201_v63 = vmov 36  }
 0x539   : > { %v1180_v43 = vadd.f32 %v1178_v23, %v1164_v46  ;;  %v1181_v4 = vadd.f32 %v1179_v50, %v1165_v37  ;;  %2056 = vset.pattern.permute.xlu0 %v2195_v31  ;;  %v2199_v46 = vmov 35   ;;  %v1216_v37 = vpop.permute.xlu0 %1215 }
 0x53a   : > { %1299 = vrot.lane.b32.xlu1 %v2806_v49, %s2174_s27  ;;  %1322 = vperm.xlu0 %2056, %v2329_v17   ;;  %v1218_v51 = vmul.f32 %v1216_v37, %v2336_v24  ;;  %v1219_v18 = vmul.f32 %v1216_v37, %v2340_v26  ;;  %v2884_v26 = vld [vmem:[%s3122_s5] sm:$0x3] }
 0x53b   : > { %v1185_v13 = vpop.permute.xlu1 %1184 }
 0x53c   : > { %v1186_v19 = vsel %vm782_vm13, %v1183_v30, %v1185_v13  ;;  %v1187_v2 = vsel %vm782_vm13, %v1185_v13, %v1183_v30  ;;  %v2202_v30 = vmov 37  }
 0x53d   : > { %v1188_v28 = vmul.f32 %v1187_v2, %v2582_v7  ;;  %v1189_v59 = vmul.f32 %v1186_v19, %v2585_v9  ;;  %v1232_v11 = vpop.permute.xlu0 %1231 }
 0x53e   : > { %1313 = vrot.lane.b32.xlu1 %v2804_v62, %s2175_s28  ;;  %2057 = vset.pattern.permute.xlu0 %v2196_v55  ;;  %v2203_v55 = vmov 38  }
 0x53f   : > { %v1194_v10 = vmul.f32 %v1192_v8, %v1188_v28  ;;  %v1195_v32 = vmul.f32 %v1192_v8, %v1189_v59  ;;  %v2834_v16 = vpop.permute.xlu1 %1387  ;;  %1330 = vperm.xlu0 %2057, %v2329_v17  }
 0x540   : > { %v2877_v24 = vsel %vm1389_vm5, %v2821_v15, %v2834_v16  ;;  %v1391_v59 = vsel %vm1389_vm5, %v2834_v16, %v2821_v15 }
 0x541   : > { %v1196_v36 = vadd.f32 %v1194_v10, %v1180_v43  ;;  %v1197_v33 = vadd.f32 %v1195_v32, %v1181_v4  ;;  %v1248_v2 = vpop.permute.xlu0 %1247 }
 0x542   : > { %1315 = vrot.lane.b32.xlu1 %v2806_v49, %s2175_s28 }
 0x543   : > { %v1199_v39 = vpop.permute.xlu1 %1198  ;;  %1339 = vrot.lane.b32.xlu0 %v2806_v49, %s2172_s25 }
 0x544   : > { %2060 = vset.pattern.permute.xlu0 %v2197_v34 }
 0x545   : > { %v1257_v16 = vpop.permute.xlu0 %1256 }
 0x546   : > { %1346 = vperm.xlu1 %2058, %v2329_v17  }
 0x547   : > { %v1201_v58 = vpop.permute.xlu1 %1200  ;;  %1353 = vrot.lane.b32.xlu0 %v2804_v62, %s2176_s30 }
 0x548   : > { %v1202_v29 = vsel %vm812_vm15, %v1199_v39, %v1201_v58  ;;  %v1203_v60 = vsel %vm812_vm15, %v1201_v58, %v1199_v39 }
 0x549   : > { %v1204_v12 = vmul.f32 %v1203_v60, %v2611_v52  ;;  %v1205_v45 = vmul.f32 %v1202_v29, %v2614_v44 }
 0x54a   : > { %1337 = vrot.lane.b32.xlu1 %v2804_v62, %s2172_s25 }
 0x54b   : > { %v1210_v0 = vmul.f32 %v1208_v20, %v1204_v12  ;;  %v1211_v35 = vmul.f32 %v1208_v20, %v1205_v45  ;;  %v2852_v61 = vpop.permute.xlu1 %1500  ;;  %1378 = vperm.xlu0 %2060, %v2329_v17   ;;  %2059 = vset.pattern.permute.xlu1 %v2198_v27  ;;  %v2204_v45 = vmov 41  }
 0x54d   : > { %v1212_v40 = vadd.f32 %v1210_v0, %v1196_v36  ;;  %v1213_v1 = vadd.f32 %v1211_v35, %v1197_v33  ;;  %v2899_v33 = vsel %vm1393_vm6, %v1391_v59, 0.0  ;;  %v2212_v59 = vmov 47  }
 0x54e   : > { %1362 = vperm.xlu1 %2059, %v2329_v17  }
 0x54f   : > { %v2856_v25 = vpop.permute.xlu1 %1502  ;;  %2061 = vset.pattern.permute.xlu0 %v2199_v46  ;;  %v1220_v43 = vadd.f32 %v1218_v51, %v1212_v40  ;;  %v1221_v4 = vadd.f32 %v1219_v18, %v1213_v1  ;;  %v2207_v51 = vmov 44   ;;  %v2208_v18 = vmov 40  }
 0x550   : > { %1405 = vperm.xlu0 %2061, %v2329_v17  }
 0x552   : > { %1355 = vrot.lane.b32.xlu1 %v2806_v49, %s2176_s30 }
 0x553   : > { %v1223_v38 = vpop.permute.xlu1 %1222  ;;  %2065 = vset.pattern.permute.xlu1 %v2200_v54  ;;  %v2205_v54 = vmov 42  }
 0x554   : > { %2062 = vset.pattern.permute.xlu0 %v2201_v63  ;;  %v2206_v63 = vmov 43  }
 0x555   : > { %1421 = vperm.xlu0 %2062, %v2329_v17  }
 0x556   : > { %1369 = vrot.lane.b32.xlu1 %v2804_v62, %s2177_s9 }
 0x557   : > { %v1225_v57 = vpop.permute.xlu1 %1224 }
 0x558   : > { %v1226_v14 = vsel %vm850_vm0, %v1223_v38, %v1225_v57  ;;  %v1227_v23 = vsel %vm850_vm0, %v1225_v57, %v1223_v38  ;;  %v1506_v57 = vsel %vm1504_vm7, %v2856_v25, %v2852_v61 }
 0x559   : > { %v1228_v50 = vmul.f32 %v1226_v14, %v2630_v5  ;;  %v1229_v17 = vmul.f32 %v1227_v23, %v2650_v21  ;;  %2063 = vset.pattern.permute.xlu0 %v2202_v30  ;;  %v2938_v14 = vsel %vm1508_vm8, %v1506_v57, 0.0  ;;  %v2211_v23 = vmov 48  }
 0x55a   : > { %1371 = vrot.lane.b32.xlu1 %v2806_v49, %s2177_s9  ;;  %1437 = vperm.xlu0 %2063, %v2884_v26  }
 0x55b   : > { %v1234_v31 = vmul.f32 %v1232_v11, %v1228_v50  ;;  %v1235_v13 = vmul.f32 %v1232_v11, %v1229_v17  ;;  %v1239_v19 = vpop.permute.xlu1 %1238  ;;  %v2209_v11 = vmov 45   ;;  %v2948_v50 = vsel %vm1504_vm7, %v2852_v61, %v2856_v25 }
 0x55d   : > { %v1236_v8 = vadd.f32 %v1234_v31, %v1220_v43  ;;  %v1237_v28 = vadd.f32 %v1235_v13, %v1221_v4 }
 0x55e   : > { %2064 = vset.pattern.permute.xlu0 %v2203_v55  ;;  %1396 = vrot.lane.b32.xlu1 %v2877_v24, %s2173_s26 }
 0x55f   : > { %v1241_v10 = vpop.permute.xlu1 %1240  ;;  %1445 = vperm.xlu0 %2064, %v2884_v26  }
 0x560   : > { %v1242_v32 = vsel %vm880_vm14, %v1239_v19, %v1241_v10  ;;  %v1243_v36 = vsel %vm880_vm14, %v1241_v10, %v1239_v19 }
 0x561   : > { %v1244_v39 = vmul.f32 %v1242_v32, %v2623_v3  ;;  %v1245_v15 = vmul.f32 %v1243_v36, %v2626_v22 }
 0x562   : > { %1398 = vrot.lane.b32.xlu1 %v2899_v33, %s2173_s26 }
 0x563   : > { %v1250_v34 = vmul.f32 %v1248_v2, %v1244_v39  ;;  %v1251_v58 = vmul.f32 %v1248_v2, %v1245_v15  ;;  %v1255_v29 = vpop.permute.xlu1 %1254  ;;  %1454 = vrot.lane.b32.xlu0 %v2899_v33, %s2172_s25 }
 0x564   : > { %v1258_v60 = vsel %vm910_vm1, %v1255_v29, %v1257_v16  ;;  %v1259_v12 = vsel %vm910_vm1, %v1257_v16, %v1255_v29  ;;  %2067 = vset.pattern.permute.xlu0 %v2204_v45 }
 0x565   : > { %v1252_v20 = vadd.f32 %v1250_v34, %v1236_v8  ;;  %v1253_v0 = vadd.f32 %v1251_v58, %v1237_v28  ;;  %v1260_v35 = vmul.f32 %v1258_v60, %v2662_v53  ;;  %v1261_v27 = vmul.f32 %v1259_v12, %v2665_v56 }
 0x566   : > { %1412 = vrot.lane.b32.xlu1 %v2877_v24, %s2174_s27 }
 0x567   : > { %v1264_v40 = vpop.permute.xlu1 %1263  ;;  %1468 = vrot.lane.b32.xlu0 %v2877_v24, %s2176_s30 }
 0x568   : > { %v1266_v1 = vmul.f32 %v1264_v40, %v1260_v35  ;;  %v1267_v46 = vmul.f32 %v1264_v40, %v1261_v27 }
 0x56a   : > { %v1268_v37 = vadd.f32 %v1266_v1, %v1252_v20  ;;  %v1269_v38 = vadd.f32 %v1267_v46, %v1253_v0  ;;  %1414 = vrot.lane.b32.xlu1 %v2899_v33, %s2174_s27 }
 0x56b   : > { %1493 = vperm.xlu0 %2067, %v2884_v26  }
 0x56c   : > { %v1291_v61 = vpop.permute.xlu1 %1290 }
 0x56e   : > { %1428 = vrot.lane.b32.xlu1 %v2877_v24, %s2175_s28 }
 0x56f   : > { %2068 = vset.pattern.permute.xlu0 %v2205_v54 }
 0x570   : > { %1520 = vperm.xlu0 %2068, %v2884_v26  }
 0x572   : > { %1430 = vrot.lane.b32.xlu1 %v2899_v33, %s2175_s28 }
 0x574   : > { %2069 = vset.pattern.permute.xlu0 %v2206_v63 }
 0x575   : > { %1536 = vperm.xlu0 %2069, %v2884_v26  }
 0x576   : > { %1461 = vperm.xlu1 %2065, %v2884_v26  }
 0x579   : > { %2070 = vset.pattern.permute.xlu0 %v2207_v51 }
 0x57a   : > { %1552 = vperm.xlu0 %2070, %v2884_v26   ;;  %1452 = vrot.lane.b32.xlu1 %v2877_v24, %s2172_s25 }
 0x57b   : > { %2066 = vset.pattern.permute.xlu1 %v2208_v18 }
 0x57e   : > { %2071 = vset.pattern.permute.xlu0 %v2209_v11  ;;  %1477 = vperm.xlu1 %2066, %v2884_v26  }
 0x57f   : > { %1560 = vperm.xlu0 %2071, %v2884_v26  }
 0x582   : > { %1470 = vrot.lane.b32.xlu1 %v2899_v33, %s2176_s30 }
 0x583   : > { %1569 = vrot.lane.b32.xlu0 %v2938_v14, %s2172_s25  ;;  %2072 = vset.pattern.permute.xlu1 %v2210_v6 }
 0x584   : > { %2074 = vset.pattern.permute.xlu0 %v2211_v23 }
 0x586   : > { %1484 = vrot.lane.b32.xlu1 %v2877_v24, %s2177_s9 }
 0x587   : > { %1583 = vrot.lane.b32.xlu0 %v2948_v50, %s2176_s30 }
 0x58a   : > { %1486 = vrot.lane.b32.xlu1 %v2899_v33, %s2177_s9 }
 0x58b   : > { %1608 = vperm.xlu0 %2074, %v2884_v26  }
 0x58e   : > { %1511 = vrot.lane.b32.xlu1 %v2948_v50, %s2173_s26 }
 0x592   : > { %1513 = vrot.lane.b32.xlu1 %v2938_v14, %s2173_s26  ;;  %s3105_s26 = smov 0  }
 0x596   : > { %1527 = vrot.lane.b32.xlu1 %v2948_v50, %s2174_s27 }
 0x59a   : > { %1529 = vrot.lane.b32.xlu1 %v2938_v14, %s2174_s27 }
 0x59e   : > { %1543 = vrot.lane.b32.xlu1 %v2948_v50, %s2175_s28 }
 0x5a2   : > { %1545 = vrot.lane.b32.xlu1 %v2938_v14, %s2175_s28 }
 0x5a3   : > { %v1282_v25 = vpop.permute.xlu0 %1281 }
 0x5a4   : > { %v1284_v17 = vpop.permute.xlu1 %1283 }
 0x5a5   : > { %v1285_v30 = vsel %vm751_vm12, %v1282_v25, %v1284_v17  ;;  %v1286_v43 = vsel %vm751_vm12, %v1284_v17, %v1282_v25 }
 0x5a6   : > { %v1287_v4 = vmul.f32 %v1286_v43, %v2555_v47  ;;  %v1288_v31 = vmul.f32 %v1285_v30, %v2558_v48  ;;  %1576 = vperm.xlu1 %2072, %v2884_v26  }
 0x5a8   : > { %v1293_v13 = vmul.f32 %v1291_v61, %v1287_v4  ;;  %v1294_v19 = vmul.f32 %v1291_v61, %v1288_v31  ;;  %v1298_v2 = vpop.permute.xlu1 %1297 }
 0x5aa   : > { %1567 = vrot.lane.b32.xlu1 %v2948_v50, %s2172_s25  ;;  %v1295_v8 = vadd.f32 %v1293_v13, %v1268_v37  ;;  %v1296_v28 = vadd.f32 %v1294_v19, %v1269_v38  ;;  %s1629_s25 = sld [smem:[#allocation6]] }
 0x5ab   : > { %2073 = vset.pattern.permute.xlu1 %v2212_v59 }
 0x5ac   : > { %v1300_v55 = vpop.permute.xlu1 %1299 }
 0x5ad   : > { %v1301_v10 = vsel %vm782_vm13, %v1298_v2, %v1300_v55  ;;  %v1302_v32 = vsel %vm782_vm13, %v1300_v55, %v1298_v2 }
 0x5ae   : > { %v1303_v36 = vmul.f32 %v1302_v32, %v2582_v7  ;;  %v1304_v39 = vmul.f32 %v1301_v10, %v2585_v9  ;;  %1592 = vperm.xlu1 %2073, %v2884_v26  }
 0x5b0   : > { %v1314_v15 = vpop.permute.xlu1 %1313  ;;  %v1307_v16 = vpop.permute.xlu0 %1306 }
 0x5b1   : > { %v1309_v34 = vmul.f32 %v1307_v16, %v1303_v36  ;;  %v1310_v58 = vmul.f32 %v1307_v16, %v1304_v39 }
 0x5b2   : > { %1585 = vrot.lane.b32.xlu1 %v2938_v14, %s2176_s30 }
 0x5b3   : > { %v1311_v29 = vadd.f32 %v1309_v34, %v1295_v8  ;;  %v1312_v60 = vadd.f32 %v1310_v58, %v1296_v28 }
 0x5b4   : > { %v1316_v12 = vpop.permute.xlu1 %1315 }
 0x5b5   : > { %v1317_v45 = vsel %vm812_vm15, %v1314_v15, %v1316_v12  ;;  %v1318_v20 = vsel %vm812_vm15, %v1316_v12, %v1314_v15  ;;  %v1323_v0 = vpop.permute.xlu0 %1322 }
 0x5b6   : > { %v1319_v35 = vmul.f32 %v1318_v20, %v2611_v52  ;;  %v1320_v26 = vmul.f32 %v1317_v45, %v2614_v44  ;;  %1599 = vrot.lane.b32.xlu1 %v2948_v50, %s2177_s9 }
 0x5b8   : > { %v1325_v27 = vmul.f32 %v1323_v0, %v1319_v35  ;;  %v1326_v40 = vmul.f32 %v1323_v0, %v1320_v26 }
 0x5ba   : > { %v1327_v1 = vadd.f32 %v1325_v27, %v1311_v29  ;;  %v1328_v46 = vadd.f32 %v1326_v40, %v1312_v60  ;;  %1601 = vrot.lane.b32.xlu1 %v2938_v14, %s2177_s9  ;;  %v1331_v37 = vpop.permute.xlu0 %1330 }
 0x5bb   : > { %v1333_v54 = vmul.f32 %v1331_v37, %v2804_v62  ;;  %v1334_v63 = vmul.f32 %v1331_v37, %v2806_v49 }
 0x5bd   : > { %v1335_v61 = vadd.f32 %v1333_v54, %v1327_v1  ;;  %v1336_v25 = vadd.f32 %v1334_v63, %v1328_v46 }
 0x5be   : > { %v1340_v51 = vpop.permute.xlu0 %1339 }
 0x5c1   : > { %v1347_v38 = vpop.permute.xlu1 %1346 }
 0x5c2   : > { %v1354_v49 = vpop.permute.xlu0 %1353 }
 0x5c5   : > { %v1338_v18 = vpop.permute.xlu1 %1337 }
 0x5c6   : > { %v1341_v57 = vsel %vm850_vm0, %v1338_v18, %v1340_v51  ;;  %v1342_v11 = vsel %vm850_vm0, %v1340_v51, %v1338_v18  ;;  %v1379_v58 = vpop.permute.xlu0 %1378 }
 0x5c7   : > { %v1343_v6 = vmul.f32 %v1341_v57, %v2630_v5  ;;  %v1344_v23 = vmul.f32 %v1342_v11, %v2650_v21 }
 0x5c9   : > { %v1349_v17 = vmul.f32 %v1347_v38, %v1343_v6  ;;  %v1350_v30 = vmul.f32 %v1347_v38, %v1344_v23  ;;  %v1363_v43 = vpop.permute.xlu1 %1362 }
 0x5cb   : > { %v1351_v62 = vadd.f32 %v1349_v17, %v1335_v61  ;;  %v1352_v4 = vadd.f32 %v1350_v30, %v1336_v25  ;;  %v1406_v1 = vpop.permute.xlu0 %1405 }
 0x5cd   : > { %v1356_v31 = vpop.permute.xlu1 %1355 }
 0x5ce   : > { %v1357_v13 = vsel %vm880_vm14, %v1354_v49, %v1356_v31  ;;  %v1358_v19 = vsel %vm880_vm14, %v1356_v31, %v1354_v49 }
 0x5cf   : > { %v1359_v2 = vmul.f32 %v1357_v13, %v2623_v3  ;;  %v1360_v8 = vmul.f32 %v1358_v19, %v2626_v22 }
 0x5d0   : > { %v1422_v57 = vpop.permute.xlu0 %1421 }
 0x5d1   : > { %v1365_v28 = vmul.f32 %v1363_v43, %v1359_v2  ;;  %v1366_v59 = vmul.f32 %v1363_v43, %v1360_v8  ;;  %v1370_v55 = vpop.permute.xlu1 %1369 }
 0x5d3   : > { %v1367_v10 = vadd.f32 %v1365_v28, %v1351_v62  ;;  %v1368_v32 = vadd.f32 %v1366_v59, %v1352_v4 }
 0x5d5   : > { %v1372_v36 = vpop.permute.xlu1 %1371  ;;  %v1438_v23 = vpop.permute.xlu0 %1437 }
 0x5d6   : > { %v1373_v39 = vsel %vm910_vm1, %v1370_v55, %v1372_v36  ;;  %v1374_v15 = vsel %vm910_vm1, %v1372_v36, %v1370_v55 }
 0x5d7   : > { %v1375_v16 = vmul.f32 %v1373_v39, %v2662_v53  ;;  %v1376_v34 = vmul.f32 %v1374_v15, %v2665_v56 }
 0x5d9   : > { %v1381_v29 = vmul.f32 %v1379_v58, %v1375_v16  ;;  %v1382_v60 = vmul.f32 %v1379_v58, %v1376_v34  ;;  %v1397_v12 = vpop.permute.xlu1 %1396 }
 0x5da   : > { %v1446_v25 = vpop.permute.xlu0 %1445 }
 0x5db   : > { %v1383_v45 = vadd.f32 %v1381_v29, %v1367_v10  ;;  %v1384_v20 = vadd.f32 %v1382_v60, %v1368_v32 }
 0x5dd   : > { %v1399_v0 = vpop.permute.xlu1 %1398 }
 0x5de   : > { %v1400_v35 = vsel %vm751_vm12, %v1397_v12, %v1399_v0  ;;  %v1401_v26 = vsel %vm751_vm12, %v1399_v0, %v1397_v12  ;;  %v1455_v43 = vpop.permute.xlu0 %1454 }
 0x5df   : > { %v1402_v27 = vmul.f32 %v1401_v26, %v2555_v47  ;;  %v1403_v40 = vmul.f32 %v1400_v35, %v2558_v48 }
 0x5e1   : > { %v1408_v46 = vmul.f32 %v1406_v1, %v1402_v27  ;;  %v1409_v37 = vmul.f32 %v1406_v1, %v1403_v40  ;;  %v1413_v38 = vpop.permute.xlu1 %1412 }
 0x5e2   : > { %v1469_v4 = vpop.permute.xlu0 %1468 }
 0x5e3   : > { %v1410_v54 = vadd.f32 %v1408_v46, %v1383_v45  ;;  %v1411_v63 = vadd.f32 %v1409_v37, %v1384_v20 }
 0x5e5   : > { %v1415_v51 = vpop.permute.xlu1 %1414 }
 0x5e6   : > { %v1494_v31 = vpop.permute.xlu0 %1493  ;;  %v1416_v28 = vsel %vm782_vm13, %v1413_v38, %v1415_v51  ;;  %v1417_v59 = vsel %vm782_vm13, %v1415_v51, %v1413_v38 }
 0x5e7   : > { %v1418_v32 = vmul.f32 %v1417_v59, %v2582_v7  ;;  %v1419_v36 = vmul.f32 %v1416_v28, %v2585_v9 }
 0x5e9   : > { %v1429_v18 = vpop.permute.xlu1 %1428  ;;  %v1424_v58 = vmul.f32 %v1422_v57, %v1418_v32  ;;  %v1425_v29 = vmul.f32 %v1422_v57, %v1419_v36 }
 0x5eb   : > { %v3023_v2 = vpop.permute.xlu0 %1520  ;;  %v1426_v26 = vadd.f32 %v1424_v58, %v1410_v54  ;;  %v1427_v27 = vadd.f32 %v1425_v29, %v1411_v63 }
 0x5ed   : > { %v1431_v11 = vpop.permute.xlu1 %1430 }
 0x5ee   : > { %v1432_v55 = vsel %vm812_vm15, %v1429_v18, %v1431_v11  ;;  %v1433_v10 = vsel %vm812_vm15, %v1431_v11, %v1429_v18 }
 0x5ef   : > { %v1434_v16 = vmul.f32 %v1433_v10, %v2611_v52  ;;  %v1435_v34 = vmul.f32 %v1432_v55, %v2614_v44 }
 0x5f0   : > { %v3035_v39 = vpop.permute.xlu0 %1536 }
 0x5f1   : > { %v1462_v6 = vpop.permute.xlu1 %1461  ;;  %v1440_v12 = vmul.f32 %v1438_v23, %v1434_v16  ;;  %v1441_v45 = vmul.f32 %v1438_v23, %v1435_v34  ;;  %v1448_v23 = vmul.f32 %v1446_v25, %v2877_v24 }
 0x5f3   : > { %v1442_v51 = vadd.f32 %v1440_v12, %v1426_v26  ;;  %v1443_v18 = vadd.f32 %v1441_v45, %v1427_v27 }
 0x5f5   : > { %v1453_v61 = vpop.permute.xlu1 %1452  ;;  %v1553_v35 = vpop.permute.xlu0 %1552  ;;  %v1450_v10 = vadd.f32 %v1448_v23, %v1442_v51 }
 0x5f6   : > { %v1456_v20 = vsel %vm850_vm0, %v1453_v61, %v1455_v43  ;;  %v1457_v0 = vsel %vm850_vm0, %v1455_v43, %v1453_v61  ;;  %v1449_v61 = vmul.f32 %v1446_v25, %v2899_v33 }
 0x5f7   : > { %v1458_v37 = vmul.f32 %v1456_v20, %v2630_v5  ;;  %v1459_v38 = vmul.f32 %v1457_v0, %v2650_v21 }
 0x5f8   : > { %v1451_v32 = vadd.f32 %v1449_v61, %v1443_v18 }
 0x5f9   : > { %v1478_v17 = vpop.permute.xlu1 %1477  ;;  %v1465_v28 = vmul.f32 %v1462_v6, %v1459_v38 }
 0x5fd   : > { %v1471_v30 = vpop.permute.xlu1 %1470 }
 0x5fe   : > { %v1472_v40 = vsel %vm880_vm14, %v1469_v4, %v1471_v30  ;;  %v1473_v1 = vsel %vm880_vm14, %v1471_v30, %v1469_v4  ;;  %v1561_v30 = vpop.permute.xlu0 %1560  ;;  %v1464_v4 = vmul.f32 %v1462_v6, %v1458_v37 }
 0x5ff   : > { %v1474_v57 = vmul.f32 %v1472_v40, %v2623_v3  ;;  %v1475_v11 = vmul.f32 %v1473_v1, %v2626_v22 }
 0x601   : > { %v1485_v62 = vpop.permute.xlu1 %1484  ;;  %v1481_v24 = vmul.f32 %v1478_v17, %v1475_v11 }
 0x605   : > { %v1487_v49 = vpop.permute.xlu1 %1486 }
 0x606   : > { %v1488_v54 = vsel %vm910_vm1, %v1485_v62, %v1487_v49  ;;  %v1489_v63 = vsel %vm910_vm1, %v1487_v49, %v1485_v62  ;;  %v1480_v49 = vmul.f32 %v1478_v17, %v1474_v57  ;;  %v1570_v17 = vpop.permute.xlu0 %1569 }
 0x607   : > { %v1490_v36 = vmul.f32 %v1488_v54, %v2662_v53  ;;  %v1491_v62 = vmul.f32 %v1489_v63, %v2665_v56 }
 0x609   : > { %v1512_v13 = vpop.permute.xlu1 %1511  ;;  %v1496_v12 = vmul.f32 %v1494_v31, %v1490_v36  ;;  %v1497_v45 = vmul.f32 %v1494_v31, %v1491_v62 }
 0x60a   : > { %v1584_v37 = vpop.permute.xlu0 %1583 }
 0x60d   : > { %v1514_v19 = vpop.permute.xlu1 %1513 }
 0x60e   : > { %v1515_v59 = vsel %vm751_vm12, %v1512_v13, %v1514_v19  ;;  %v1516_v55 = vsel %vm751_vm12, %v1514_v19, %v1512_v13  ;;  %v1466_v13 = vadd.f32 %v1464_v4, %v1450_v10  ;;  %v1467_v19 = vadd.f32 %v1465_v28, %v1451_v32 }
 0x60f   : > { %v1517_v25 = vmul.f32 %v1516_v55, %v2555_v47  ;;  %v1518_v16 = vmul.f32 %v1515_v59, %v2558_v48  ;;  %v1563_v59 = vmul.f32 %v1561_v30, %v2948_v50  ;;  %v1564_v55 = vmul.f32 %v1561_v30, %v2938_v14 }
 0x610   : > { %v1483_v47 = vadd.f32 %v1481_v24, %v1467_v19 }
 0x611   : > { %v1528_v8 = vpop.permute.xlu1 %1527  ;;  %v1523_v48 = vmul.f32 %v3023_v2, %v1517_v25  ;;  %v1524_v0 = vmul.f32 %v3023_v2, %v1518_v16 }
 0x615   : > { %v1530_v15 = vpop.permute.xlu1 %1529 }
 0x616   : > { %v1531_v33 = vsel %vm782_vm13, %v1528_v8, %v1530_v15  ;;  %v1532_v6 = vsel %vm782_vm13, %v1530_v15, %v1528_v8  ;;  %v1482_v15 = vadd.f32 %v1480_v49, %v1466_v13 }
 0x617   : > { %v1533_v20 = vmul.f32 %v1532_v6, %v2582_v7  ;;  %v1534_v8 = vmul.f32 %v1531_v33, %v2585_v9  ;;  %v1609_v33 = vpop.permute.xlu0 %1608 }
 0x618   : > { %v1498_v1 = vadd.f32 %v1496_v12, %v1482_v15 }
 0x619   : > { %v1544_v60 = vpop.permute.xlu1 %1543  ;;  %v1540_v31 = vmul.f32 %v3035_v39, %v1534_v8 }
 0x61a   : > { %v1525_v38 = vadd.f32 %v1523_v48, %v1498_v1 }
 0x61d   : > { %v1546_v46 = vpop.permute.xlu1 %1545 }
 0x61e   : > { %v1547_v58 = vsel %vm812_vm15, %v1544_v60, %v1546_v46  ;;  %v1548_v29 = vsel %vm812_vm15, %v1546_v46, %v1544_v60  ;;  %v1499_v60 = vadd.f32 %v1497_v45, %v1483_v47  ;;  %v1539_v46 = vmul.f32 %v3035_v39, %v1533_v20 }
 0x61f   : > { %v1549_v26 = vmul.f32 %v1548_v29, %v2611_v52  ;;  %v1550_v27 = vmul.f32 %v1547_v58, %v2614_v44  ;;  %v1630_v47 = vstv %s1629_s25 }
 0x620   : > { %v1526_v2 = vadd.f32 %v1524_v0, %v1499_v60  ;;  %v1541_v11 = vadd.f32 %v1539_v46, %v1525_v38 }
 0x621   : > { %v1577_v43 = vpop.permute.xlu1 %1576  ;;  %v1555_v51 = vmul.f32 %v1553_v35, %v1549_v26  ;;  %v1556_v52 = vmul.f32 %v1553_v35, %v1550_v27 }
 0x622   : > { %v1542_v39 = vadd.f32 %v1540_v31, %v1526_v2 }
 0x623   : > { %v1557_v23 = vadd.f32 %v1555_v51, %v1541_v11  ;;  %v3134_v51 = vld [vmem:[#allocation7_spill] sm:$0xff]  ;;  %v3135_v11 = vlaneseq }
 0x624   : > { %v1558_v61 = vadd.f32 %v1556_v52, %v1542_v39 }
 0x625   : > { %v1568_v34 = vpop.permute.xlu1 %1567  ;;  %v1565_v24 = vadd.f32 %v1563_v59, %v1557_v23 }
 0x626   : > { %v1571_v7 = vsel %vm850_vm0, %v1568_v34, %v1570_v17  ;;  %v1572_v9 = vsel %vm850_vm0, %v1570_v17, %v1568_v34 }
 0x627   : > { %v1573_v54 = vmul.f32 %v1571_v7, %v2630_v5  ;;  %v1574_v63 = vmul.f32 %v1572_v9, %v2650_v21  ;;  %v1566_v5 = vadd.f32 %v1564_v55, %v1558_v61  ;;  %v2213_v9 = vmov 1966171168  }
 0x629   : > { %v1593_v40 = vpop.permute.xlu1 %1592  ;;  %v1579_v10 = vmul.f32 %v1577_v43, %v1573_v54  ;;  %v1580_v32 = vmul.f32 %v1577_v43, %v1574_v63 }
 0x62b   : > { %v1582_v6 = vadd.f32 %v1580_v32, %v1566_v5 }
 0x62d   : > { %v1586_v18 = vpop.permute.xlu1 %1585 }
 0x62e   : > { %v1587_v44 = vsel %vm880_vm14, %v1584_v37, %v1586_v18  ;;  %v1588_v57 = vsel %vm880_vm14, %v1586_v18, %v1584_v37  ;;  %v1649_v37 = vunpack.c.l.s4 %v2213_v9 }
 0x62f   : > { %v1589_v4 = vmul.f32 %v1587_v44, %v2623_v3  ;;  %v1590_v28 = vmul.f32 %v1588_v57, %v2626_v22  ;;  %v1581_v22 = vadd.f32 %v1579_v10, %v1565_v24 }
 0x630   : > { %v1650_v38 = vunpack.c.0.s8 %v1649_v37 }
 0x631   : > { %v1600_v35 = vpop.permute.xlu1 %1599  ;;  %v1595_v36 = vmul.f32 %v1593_v40, %v1589_v4  ;;  %v1596_v62 = vmul.f32 %v1593_v40, %v1590_v28 }
 0x632   : > { %v1653_v52 = vsub.s32 %v1650_v38, %v3134_v51 }
 0x633   : > { %v1597_v30 = vadd.f32 %v1595_v36, %v1581_v22  ;;  %v1598_v43 = vadd.f32 %v1596_v62, %v1582_v6 }
 0x635   : > { %v1602_v49 = vpop.permute.xlu1 %1601 }
 0x636   : > { %v1603_v21 = vsel %vm910_vm1, %v1600_v35, %v1602_v49  ;;  %v1604_v3 = vsel %vm910_vm1, %v1602_v49, %v1600_v35 }
 0x637   : > { %v1605_v50 = vmul.f32 %v1603_v21, %v2662_v53  ;;  %v1606_v14 = vmul.f32 %v1604_v3, %v2665_v56 }
 0x639   : > { %v1611_v25 = vmul.f32 %v1609_v33, %v1605_v50  ;;  %v1612_v16 = vmul.f32 %v1609_v33, %v1606_v14 }
 0x63b   : > { %v1613_v34 = vadd.f32 %v1611_v25, %v1597_v30  ;;  %v1614_v13 = vadd.f32 %v1612_v16, %v1598_v43 }
 0x63d   : > { %v1615_v19 = vsel %vm424_vm4, %v1613_v34, 0.0  ;;  %v1622_v58 = vsel %vm424_vm4, %v1614_v13, 0.0  ;;  %vm1665_vm4 = vcmp.lt.s32.totalorder %v3135_v11, 256 }
 0x63e   : > { %v1616_v29 = vrot.slane %v1615_v19, 4  ;;  %v1623_v41 = vrot.slane %v1622_v58, 4 }
 0x640   : > { %v1617_v17 = vadd.f32 %v1616_v29, %v1615_v19  ;;  %v1624_v12 = vadd.f32 %v1623_v41, %v1622_v58 }
 0x642   : > { %v1618_v45 = vrot.slane %v1617_v17, 2  ;;  %v1625_v20 = vrot.slane %v1624_v12, 2 }
 0x644   : > { %v1619_v53 = vadd.f32 %v1618_v45, %v1617_v17  ;;  %v1626_v8 = vadd.f32 %v1625_v20, %v1624_v12 }
 0x646   : > { %v1620_v56 = vrot.slane %v1619_v53, 1  ;;  %v1627_v15 = vrot.slane %v1626_v8, 1 }
 0x648   : > { %v1621_v48 = vadd.f32 %v1620_v56, %v1619_v53  ;;  %v1628_v0 = vadd.f32 %v1627_v15, %v1626_v8 }
 0x64a   : > { %v1631_v26 = vadd.f32 %v1630_v47, %v1621_v48  ;;  %v1632_v27 = vadd.f32 %v1630_v47, %v1628_v0 }
 0x64c   : > { %v1837_v40 = vmul.f32 -1.442695, %v1631_v26  ;;  %v1838_v1 = vmul.f32 -1.442695, %v1632_v27 }
 0x64e   : > { %2075 = vpow2.f32 %v1837_v40 }
 0x64f   : > { %2077 = vpow2.f32 %v1838_v1 }
 0x65b   : > { %v2076_v60 = vpop.eup %2075 }
 0x65c   : > { %v2078_v46 = vpop.eup %2077  ;;  %v1639_v31 = vadd.f32 1.0, %v2076_v60 }
 0x65d   : > { %v1640_v7 = vadd.f32 1.0, %v2078_v46 }
 0x65e   : > { %2079 = vrcp.f32 %v1639_v31 }
 0x65f   : > { %2081 = vrcp.f32 %v1640_v7 }
 0x66b   : > { %v2080_v2 = vpop.eup %2079 }
 0x66c   : > { %v2082_v18 = vpop.eup %2081 }
 0x66d   : > { %v1647_v44 = vcombine.low %v2080_v2, %v2082_v18 }
 0x66f   : > { %v1654_v57 = vrot.slane %v1647_v44, %v1653_v52 }
 0x671   : > { %v1661_v39 = vrot.slane %v1654_v57, %v1653_v52 }
 0x673   : > { %1667 = vst.msk [vmem:[#allocation5] sm:$0x3] %vm1665_vm4, %v1661_v39 }
 0x674 LB: >> { %v2214_v54 = vmov 0   ;;  %s1839_s27 = sshll.u32 %s2147_s26, 3  ;;  %v3136_v35 = vld [vmem:[#allocation9_spill] sm:$0xff]  ;;  %s1673_s26 = sadd.s32 1, %s2147_s26   ;;  %s2147_s26 = sphi %s3105_s26, %s1673_s26  }
 0x675   : >> { %2084 = vset.pattern.permute.xlu0 %v2214_v54  ;;  %s1682_s28 = scalar_lea.vmem [#allocation4], %s1839_s27  ;;  %s1675_s30 = sshra.s32 %s1839_s27, 3 }
 0x676   : >> { %v1683_v63 = vld [vmem:[%s1682_s28] sm:$0xff]  ;;  %s1849_s9 = sshll.u32 %s1675_s30, 4  ;;  %p1670_p6 = scmp.ge.s32.totalorder %s1673_s26, 2  }
 0x677   : >> { %1686 = vperm.xlu0 %2084, %v1683_v63   ;;  %s1679_s13 = scalar_lea.vmem %s2274_s11, %s1849_s9  ;;  %s1706_s15 = scalar_lea.vmem %s2279_s14, %s1849_s9 }
 0x678   : >> { %v1680_v61 = vld [vmem:[%s1679_s13] sm:$0xff]  ;;  %v1681_v4 = vld [vmem:[%s1679_s13 + $0x8] sm:$0xff] }
 0x67a   : >> { %v1691_v23 = vld [vmem:[#allocation5] sm:$0x3] }
 0x67b   : >> { %v1696_v28 = vrot.slane %v1691_v23, %v2547_v42  ;;  %v1700_v59 = vrot.slane %v1691_v23, %v3136_v35 }
 0x6f2   : >> { %v1687_v55 = vpop.permute.xlu0 %1686 }
 0x6f3   : >> { %v1689_v10 = vmul.f32 %v1687_v55, %v1680_v61  ;;  %v1690_v32 = vmul.f32 %v1687_v55, %v1681_v4  ;;  %1672 = sbr.rel (!%p1670_p6) target bundleno = 1652 (0x674), region = 138 }
 0x6f5   : >> { %v1703_v36 = vmul.f32 %v1696_v28, %v1689_v10  ;;  %v1704_v62 = vmul.f32 %v1700_v59, %v1690_v32 }
 0x6f7   : >> { %1707 = vst [vmem:[%s1706_s15] sm:$0xff] %v1703_v36  ;;  %1708 = vst [vmem:[%s1706_s15 + $0x8] sm:$0xff] %v1704_v62 }
 0x6f8 PF: > { %s19_s29 = sadd.s32 1, %s2119_s29  }
 0x6f9   : > { %p16_p7 = scmp.ge.s32.totalorder %s19_s29, 4  }
 0x6fb   :  { %18 = sbr.rel (!%p16_p7) target bundleno = 2 (0x2), region = 149 }

</bundles_post_ra>
